<compile_context>
chip_gen: v7x
topology: tpu7x:2x2x1
jax: 0.10.0
libtpu: 0.0.40
codegen_flags: <defaults>
</compile_context>

<pallas_src>
import functools

import jax
import jax.numpy as jnp
from jax.experimental import pallas as pl
from jax.experimental.pallas import tpu as pltpu


def _da_img_head_kernel(x_ref, w1_ref, b1_ref, w2_ref, b2_ref, o_ref, *, hidden_chunk):
    # x_ref : (1, Cin, PT)   channel-major pixel tile (channels on sublanes, pixels on lanes)
    # w1_ref: (Hid, Cin)     conv1_da weight (out, in) -- 1x1 conv == channel matmul
    # b1_ref: (Hid, 1)       conv1_da bias (column)
    # w2_ref: (Hid, 1)       conv2_da weight (column)
    # b2_ref: (1,) in SMEM   conv2_da bias (scalar)
    # o_ref : (1, 1, PT)     lane-dense output tile
    x = x_ref[0]                                    # (Cin, PT)
    hidden = w1_ref.shape[0]
    pt = x.shape[-1]

    acc = jnp.zeros((1, pt), jnp.float32)
    # Static (unrolled) loop over hidden chunks: keeps the intermediate small instead of
    # materializing the full (hidden, PT) f32 tensor.
    for h in range(0, hidden, hidden_chunk):
        hc = min(hidden_chunk, hidden - h)
        w1_c = w1_ref[pl.ds(h, hc), :]              # (hc, Cin)
        # conv1 chunk on the MXU, f32 accumulation.
        t = jnp.dot(w1_c, x, preferred_element_type=jnp.float32)      # (hc, PT)
        t = jnp.maximum(t + b1_ref[pl.ds(h, hc), :], 0.0)             # bias + ReLU (VPU)
        # conv2 (512 -> 1) off the MXU: VPU multiply + sublane reduction (XLU).
        acc = acc + jnp.sum(t * w2_ref[pl.ds(h, hc), :], axis=0, keepdims=True)

    res = acc + b2_ref[0]
    o_ref[...] = res.reshape(o_ref.shape).astype(o_ref.dtype)


def _choose_pixel_tile(P, max_pixels_per_tile):
    """Pick (tile, padded_extent).  Full extent (no pad) when it fits; otherwise pad P to a
    multiple of 128 and take the largest 128-multiple tile that divides the padded extent."""
    if P <= max_pixels_per_tile:
        return P, P
    P_pad = pl.cdiv(P, 128) * 128
    tile = 128
    t = 128
    while t <= max_pixels_per_tile:
        if P_pad % t == 0:
            tile = t
        t += 128
    return tile, P_pad


@functools.partial(jax.jit, static_argnames=("max_pixels_per_tile", "hidden_chunk"))
def da_img_head(x_nchw, w1, b1, w2, b2, *, max_pixels_per_tile=1024, hidden_chunk=128):
    """x_nchw: (N, Cin, H, W); w1: (512, Cin); b1: (512,); w2: (512,); b2: (1,).
    Returns (N, 1, H, W) matching PyTorch DAImgHead."""
    N, Cin, H, W = x_nchw.shape
    hidden = w1.shape[0]
    P = H * W

    # Free reshape: NCHW is already contiguous as (N, Cin, H*W).  Pixels land on lanes.
    x_cm = x_nchw.reshape(N, Cin, P)

    PT, P_pad = _choose_pixel_tile(P, max_pixels_per_tile)
    if P_pad != P:
        # Only triggers when P > max tile AND P is not a multiple of 128 (minimal pad).
        x_cm = jnp.pad(x_cm, ((0, 0), (0, 0), (0, P_pad - P)))
    n_ptiles = P_pad // PT

    b1_col = b1.reshape(hidden, 1)
    w2_col = w2.reshape(hidden, 1)
    b2_smem = b2.reshape(1).astype(jnp.float32)

    # Rough VMEM budget (double-buffered x / weights / output + one intermediate chunk);
    # only raise the scoped limit when it is actually needed (keeps defaults otherwise).
    x_bytes = x_cm.dtype.itemsize
    w_bytes = w1.dtype.itemsize
    est = (
        2 * PT * Cin * x_bytes
        + 2 * hidden * Cin * w_bytes
        + 4 * hidden * (b1.dtype.itemsize + w2.dtype.itemsize)
        + 2 * PT * x_nchw.dtype.itemsize
        + 2 * min(hidden_chunk, hidden) * PT * 4
    )
    cp_kwargs = dict(dimension_semantics=("parallel", "parallel"))
    if est > (12 << 20):
        cp_kwargs["vmem_limit_bytes"] = int(min(max(2 * est, 32 << 20), 64 << 20))
    compiler_params = pltpu.CompilerParams(**cp_kwargs)

    out = pl.pallas_call(
        functools.partial(_da_img_head_kernel, hidden_chunk=hidden_chunk),
        out_shape=jax.ShapeDtypeStruct((N, 1, P_pad), x_nchw.dtype),
        grid_spec=pltpu.PrefetchScalarGridSpec(
            num_scalar_prefetch=0,
            grid=(N, n_ptiles),
            in_specs=[
                pl.BlockSpec((1, Cin, PT), lambda n, p: (n, 0, p)),      # x pixel tile
                pl.BlockSpec((hidden, Cin), lambda n, p: (0, 0)),        # w1 (resident)
                pl.BlockSpec((hidden, 1), lambda n, p: (0, 0)),          # b1
                pl.BlockSpec((hidden, 1), lambda n, p: (0, 0)),          # w2
                pl.BlockSpec(memory_space=pltpu.MemorySpace.SMEM),       # b2 scalar
            ],
            out_specs=pl.BlockSpec((1, 1, PT), lambda n, p: (n, 0, p)),  # lane-dense out
        ),
        compiler_params=compiler_params,
    )(x_cm, w1, b1_col, w2_col, b2_smem)

    if P_pad != P:
        out = out[:, :, :P]
    return out.reshape(N, 1, H, W)


def init_da_img_head_params(key, in_channels, dtype=jnp.float32):
    """Matches PyTorch init: normal(std=0.001) weights, zero biases.
    Conv2d weights (out, in, 1, 1) are stored squeezed as (out, in) / (out,)."""
    k1, k2 = jax.random.split(key)
    w1 = (jax.random.normal(k1, (512, in_channels), dtype=jnp.float32) * 0.001).astype(dtype)
    b1 = jnp.zeros((512,), dtype=dtype)
    w2 = (jax.random.normal(k2, (1, 512), dtype=jnp.float32) * 0.001).reshape(512).astype(dtype)
    b2 = jnp.zeros((1,), dtype=dtype)
    return w1, b1, w2, b2


def _reference(x_nchw, w1, b1, w2, b2):
    # Pure-JAX reference of the two 1x1 convs.
    t = jnp.einsum("nchw,dc->ndhw", x_nchw, w1) + b1[None, :, None, None]
    t = jnp.maximum(t, 0.0)
    o = jnp.einsum("ndhw,d->nhw", t, w2)[:, None, :, :] + b2.reshape(())
    return o


if __name__ == "__main__":
    key = jax.random.PRNGKey(0)
    k_x, k_p = jax.random.split(key)

    N, Cin, H, W = 2, 4, 16, 16
    x = jax.random.normal(k_x, (N, Cin, H, W), dtype=jnp.float32)

    w1, b1, w2, b2 = init_da_img_head_params(k_p, Cin)

    out = da_img_head(x, w1, b1, w2, b2)
    out = jax.block_until_ready(out)

    assert out.shape == (N, 1, H, W), out.shape

    ref = _reference(x, w1, b1, w2, b2)
    assert jnp.allclose(out, ref, atol=1e-5, rtol=1e-5), "mismatch vs reference"

    print("KERNEL_OK")
</pallas_src>

<mosaic_0001>
module attributes {stable_mosaic.version = 11 : i64} {
  func.func @_da_img_head_kernel(%arg0: i32, %arg1: i32, %arg2: memref<1x4x256xf32, #tpu.memory_space<vmem>>, %arg3: memref<512x4xf32, #tpu.memory_space<vmem>>, %arg4: memref<512x1xf32, #tpu.memory_space<vmem>>, %arg5: memref<512x1xf32, #tpu.memory_space<vmem>>, %arg6: memref<1xf32, #tpu.memory_space<smem>>, %arg7: memref<1x1x256xf32, #tpu.memory_space<vmem>>) attributes {dimension_semantics = [#tpu.dimension_semantics<parallel>, #tpu.dimension_semantics<parallel>], iteration_bounds = array<i64: 2, 1>, scalar_prefetch = 0 : i64, scratch_operands = 0 : i64, tpu.core_type = #tpu.core_type<tc>, window_params = [{transform_indices = @transform_0, window_bounds = array<i64: 1, 4, 256>}, {pipeline_mode = #tpu.pipeline_mode<synchronous>, transform_indices = @transform_1, window_bounds = array<i64: 512, 4>}, {pipeline_mode = #tpu.pipeline_mode<synchronous>, transform_indices = @transform_2, window_bounds = array<i64: 512, 1>}, {pipeline_mode = #tpu.pipeline_mode<synchronous>, transform_indices = @transform_3, window_bounds = array<i64: 512, 1>}, {transform_indices = @transform_4, window_bounds = array<i64: 1>}, {transform_indices = @transform_5, window_bounds = array<i64: 1, 1, 256>}]} {
    %c0 = arith.constant 0 : index
    %c0_0 = arith.constant 0 : index
    %c0_1 = arith.constant 0 : index
    %0 = vector.load %arg2[%c0, %c0_0, %c0_1] : memref<1x4x256xf32, #tpu.memory_space<vmem>>, vector<1x4x256xf32>
    %1 = vector.shape_cast %0 : vector<1x4x256xf32> to vector<4x256xf32>
    %cst = arith.constant 0.000000e+00 : f32
    %2 = vector.broadcast %cst : f32 to vector<1x256xf32>
    %c0_2 = arith.constant 0 : index
    %c0_3 = arith.constant 0 : index
    %3 = vector.load %arg3[%c0_2, %c0_3] : memref<512x4xf32, #tpu.memory_space<vmem>>, vector<128x4xf32>
    %cst_4 = arith.constant dense<0.000000e+00> : vector<128x256xf32>
    %4 = tpu.matmul %3, %1, %cst_4 {dimension_numbers = #tpu.dot_dimension_numbers<[1], [0], [0], [1], [0, 0, 1, 1], [], []>} : vector<128x4xf32>, vector<4x256xf32>, vector<128x256xf32> -> vector<128x256xf32>
    %c0_5 = arith.constant 0 : index
    %c0_6 = arith.constant 0 : index
    %5 = vector.load %arg4[%c0_5, %c0_6] : memref<512x1xf32, #tpu.memory_space<vmem>>, vector<128x1xf32>
    %6 = vector.broadcast %5 : vector<128x1xf32> to vector<128x256xf32>
    %7 = arith.addf %4, %6 : vector<128x256xf32>
    %cst_7 = arith.constant 0.000000e+00 : f32
    %8 = vector.broadcast %cst_7 : f32 to vector<128x256xf32>
    %9 = arith.maximumf %7, %8 : vector<128x256xf32>
    %c0_8 = arith.constant 0 : index
    %c0_9 = arith.constant 0 : index
    %10 = vector.load %arg5[%c0_8, %c0_9] : memref<512x1xf32, #tpu.memory_space<vmem>>, vector<128x1xf32>
    %11 = vector.broadcast %10 : vector<128x1xf32> to vector<128x256xf32>
    %12 = arith.mulf %9, %11 : vector<128x256xf32>
    %cst_10 = arith.constant dense<0.000000e+00> : vector<256xf32>
    %13 = vector.multi_reduction <add>, %12, %cst_10 [0] : vector<128x256xf32> to vector<256xf32>
    %14 = vector.shape_cast %13 : vector<256xf32> to vector<1x256xf32>
    %15 = arith.addf %2, %14 : vector<1x256xf32>
    %c128 = arith.constant 128 : index
    %c0_11 = arith.constant 0 : index
    %16 = vector.load %arg3[%c128, %c0_11] : memref<512x4xf32, #tpu.memory_space<vmem>>, vector<128x4xf32>
    %cst_12 = arith.constant dense<0.000000e+00> : vector<128x256xf32>
    %17 = tpu.matmul %16, %1, %cst_12 {dimension_numbers = #tpu.dot_dimension_numbers<[1], [0], [0], [1], [0, 0, 1, 1], [], []>} : vector<128x4xf32>, vector<4x256xf32>, vector<128x256xf32> -> vector<128x256xf32>
    %c128_13 = arith.constant 128 : index
    %c0_14 = arith.constant 0 : index
    %18 = vector.load %arg4[%c128_13, %c0_14] : memref<512x1xf32, #tpu.memory_space<vmem>>, vector<128x1xf32>
    %19 = vector.broadcast %18 : vector<128x1xf32> to vector<128x256xf32>
    %20 = arith.addf %17, %19 : vector<128x256xf32>
    %cst_15 = arith.constant 0.000000e+00 : f32
    %21 = vector.broadcast %cst_15 : f32 to vector<128x256xf32>
    %22 = arith.maximumf %20, %21 : vector<128x256xf32>
    %c128_16 = arith.constant 128 : index
    %c0_17 = arith.constant 0 : index
    %23 = vector.load %arg5[%c128_16, %c0_17] : memref<512x1xf32, #tpu.memory_space<vmem>>, vector<128x1xf32>
    %24 = vector.broadcast %23 : vector<128x1xf32> to vector<128x256xf32>
    %25 = arith.mulf %22, %24 : vector<128x256xf32>
    %cst_18 = arith.constant dense<0.000000e+00> : vector<256xf32>
    %26 = vector.multi_reduction <add>, %25, %cst_18 [0] : vector<128x256xf32> to vector<256xf32>
    %27 = vector.shape_cast %26 : vector<256xf32> to vector<1x256xf32>
    %28 = arith.addf %15, %27 : vector<1x256xf32>
    %c256 = arith.constant 256 : index
    %c0_19 = arith.constant 0 : index
    %29 = vector.load %arg3[%c256, %c0_19] : memref<512x4xf32, #tpu.memory_space<vmem>>, vector<128x4xf32>
    %cst_20 = arith.constant dense<0.000000e+00> : vector<128x256xf32>
    %30 = tpu.matmul %29, %1, %cst_20 {dimension_numbers = #tpu.dot_dimension_numbers<[1], [0], [0], [1], [0, 0, 1, 1], [], []>} : vector<128x4xf32>, vector<4x256xf32>, vector<128x256xf32> -> vector<128x256xf32>
    %c256_21 = arith.constant 256 : index
    %c0_22 = arith.constant 0 : index
    %31 = vector.load %arg4[%c256_21, %c0_22] : memref<512x1xf32, #tpu.memory_space<vmem>>, vector<128x1xf32>
    %32 = vector.broadcast %31 : vector<128x1xf32> to vector<128x256xf32>
    %33 = arith.addf %30, %32 : vector<128x256xf32>
    %cst_23 = arith.constant 0.000000e+00 : f32
    %34 = vector.broadcast %cst_23 : f32 to vector<128x256xf32>
    %35 = arith.maximumf %33, %34 : vector<128x256xf32>
    %c256_24 = arith.constant 256 : index
    %c0_25 = arith.constant 0 : index
    %36 = vector.load %arg5[%c256_24, %c0_25] : memref<512x1xf32, #tpu.memory_space<vmem>>, vector<128x1xf32>
    %37 = vector.broadcast %36 : vector<128x1xf32> to vector<128x256xf32>
    %38 = arith.mulf %35, %37 : vector<128x256xf32>
    %cst_26 = arith.constant dense<0.000000e+00> : vector<256xf32>
    %39 = vector.multi_reduction <add>, %38, %cst_26 [0] : vector<128x256xf32> to vector<256xf32>
    %40 = vector.shape_cast %39 : vector<256xf32> to vector<1x256xf32>
    %41 = arith.addf %28, %40 : vector<1x256xf32>
    %c384 = arith.constant 384 : index
    %c0_27 = arith.constant 0 : index
    %42 = vector.load %arg3[%c384, %c0_27] : memref<512x4xf32, #tpu.memory_space<vmem>>, vector<128x4xf32>
    %cst_28 = arith.constant dense<0.000000e+00> : vector<128x256xf32>
    %43 = tpu.matmul %42, %1, %cst_28 {dimension_numbers = #tpu.dot_dimension_numbers<[1], [0], [0], [1], [0, 0, 1, 1], [], []>} : vector<128x4xf32>, vector<4x256xf32>, vector<128x256xf32> -> vector<128x256xf32>
    %c384_29 = arith.constant 384 : index
    %c0_30 = arith.constant 0 : index
    %44 = vector.load %arg4[%c384_29, %c0_30] : memref<512x1xf32, #tpu.memory_space<vmem>>, vector<128x1xf32>
    %45 = vector.broadcast %44 : vector<128x1xf32> to vector<128x256xf32>
    %46 = arith.addf %43, %45 : vector<128x256xf32>
    %cst_31 = arith.constant 0.000000e+00 : f32
    %47 = vector.broadcast %cst_31 : f32 to vector<128x256xf32>
    %48 = arith.maximumf %46, %47 : vector<128x256xf32>
    %c384_32 = arith.constant 384 : index
    %c0_33 = arith.constant 0 : index
    %49 = vector.load %arg5[%c384_32, %c0_33] : memref<512x1xf32, #tpu.memory_space<vmem>>, vector<128x1xf32>
    %50 = vector.broadcast %49 : vector<128x1xf32> to vector<128x256xf32>
    %51 = arith.mulf %48, %50 : vector<128x256xf32>
    %cst_34 = arith.constant dense<0.000000e+00> : vector<256xf32>
    %52 = vector.multi_reduction <add>, %51, %cst_34 [0] : vector<128x256xf32> to vector<256xf32>
    %53 = vector.shape_cast %52 : vector<256xf32> to vector<1x256xf32>
    %54 = arith.addf %41, %53 : vector<1x256xf32>
    %c0_35 = arith.constant 0 : index
    %55 = memref.load %arg6[%c0_35] : memref<1xf32, #tpu.memory_space<smem>>
    %56 = vector.broadcast %55 : f32 to vector<1x256xf32>
    %57 = arith.addf %54, %56 : vector<1x256xf32>
    %58 = vector.shape_cast %57 : vector<1x256xf32> to vector<1x1x256xf32>
    %c0_36 = arith.constant 0 : index
    %c0_37 = arith.constant 0 : index
    %c0_38 = arith.constant 0 : index
    %59 = vector.load %arg7[%c0_36, %c0_37, %c0_38] : memref<1x1x256xf32, #tpu.memory_space<vmem>>, vector<1x1x256xf32>
    tpu.vector_store %arg7[%c0_36, %c0_37, %c0_38], %58 {strides = array<i32>} : memref<1x1x256xf32, #tpu.memory_space<vmem>>, vector<1x1x256xf32>,
    return
  }
  func.func @transform_0(%arg0: i32, %arg1: i32) -> (i32, i32, i32) {
    %c0_i32 = arith.constant 0 : i32
    %c0_i32_0 = arith.constant 0 : i32
    return %arg0, %c0_i32, %arg1 : i32, i32, i32
  }
  func.func @transform_1(%arg0: i32, %arg1: i32) -> (i32, i32) {
    %c0_i32 = arith.constant 0 : i32
    %c0_i32_0 = arith.constant 0 : i32
    %c0_i32_1 = arith.constant 0 : i32
    return %c0_i32, %c0_i32_0 : i32, i32
  }
  func.func @transform_2(%arg0: i32, %arg1: i32) -> (i32, i32) {
    %c0_i32 = arith.constant 0 : i32
    %c0_i32_0 = arith.constant 0 : i32
    %c0_i32_1 = arith.constant 0 : i32
    return %c0_i32, %c0_i32_0 : i32, i32
  }
  func.func @transform_3(%arg0: i32, %arg1: i32) -> (i32, i32) {
    %c0_i32 = arith.constant 0 : i32
    %c0_i32_0 = arith.constant 0 : i32
    %c0_i32_1 = arith.constant 0 : i32
    return %c0_i32, %c0_i32_0 : i32, i32
  }
  func.func @transform_4(%arg0: i32, %arg1: i32) -> i32 {
    %c0_i32 = arith.constant 0 : i32
    %c0_i32_0 = arith.constant 0 : i32
    return %c0_i32 : i32
  }
  func.func @transform_5(%arg0: i32, %arg1: i32) -> (i32, i32, i32) {
    %c0_i32 = arith.constant 0 : i32
    %c0_i32_0 = arith.constant 0 : i32
    return %arg0, %c0_i32, %arg1 : i32, i32, i32
  }
}

</mosaic_0001>

<bundles_post_ra>
// kernel: da_img_head.1
= control target key start
LH: loop header
LB: loop body
LE: loop exit
PB: predicated region body
PF: predicated region fallthrough
CT: control target
= control target key end

     0   :  { %s2653_s20 = smov 0   ;;  %s2655_s21 = smov 0   ;;  %s3857_s0 = inlined_call_operand.vmem [shape: f32[2,4,256], index: 0, kind: input, shape index: {}]   ;;  %s3858_s1 = inlined_call_operand.vmem [shape: f32[512,4], index: 1, kind: input, shape index: {}]   ;;  %s3859_s2 = inlined_call_operand.vmem [shape: f32[512,1], index: 2, kind: input, shape index: {}]   ;;  %s3860_s3 = inlined_call_operand.vmem [shape: f32[512,1], index: 3, kind: input, shape index: {}]   ;;  %s3861_s4 = inlined_call_operand.<no memory space> [shape: f32[1], index: 4, kind: input, shape index: {}]   ;;  %s3862_s5 = inlined_call_operand.vmem [shape: f32[2,1,256], index: 5, kind: output, shape index: {}]  }
   0x1   :  { %10 = sst [smem:[#allocation2]] %s3861_s4  ;;  %s2657_s22 = smov 0  }
   0x2 LB: > { %s28_s4 = sadd.s32 1, %s2611_s21  ;;  %p2484_p0 = scmp.ge.s32.totalorder %s2615_s22, 1  ;;  %s2615_s22 = sphi %s2657_s22, %s16_s22   ;;  %s2611_s21 = sphi %s2655_s21, %s3894_s21   ;;  %s2607_s20 = sphi %s2653_s20, %s3893_s20  }
   0x3   : > { %p30_p1 = scmp.ge.s32.totalorder %s28_s4, 2  ;;  %p209_p2 = scmp.lt.s32.totalorder %s2615_s22, 3 }
   0x5   : > { %s3896_s4 = smov (%p30_p1, %s28_s4), 0  ;;  %p210_p3 = pnand %p2484_p0, %p209_p2 }
   0x7   : > { %213 = sbr.rel (%p210_p3) target bundleno = 425 (0x1a9), region = 40 }
   0xe   : > { %v282_v0 = vld [vmem:[%s3859_s2 + $0x10] sm:$0xff]  ;;  %v280_v1 = vld [vmem:[%s3859_s2] sm:$0xff]  ;;  %p245_p4 = scmp.lt.s32.totalorder %s2607_s20, 1  ;;  %v2617_v2 = vmov 0   ;;  %v283_v3 = vld [vmem:[%s3859_s2 + $0x18] sm:$0xff]  ;;  %v2618_v5 = vmov 0.0  }
   0xf   : > { %2591 = vset.pattern.permute.xlu1 %v2617_v2  ;;  %2590 = vset.pattern.permute.xlu0 %v2617_v2  ;;  %v281_v4 = vld [vmem:[%s3859_s2 + $0x8] sm:$0xff]  ;;  %vm427_vm0 = vcmask 1043456   ;;  %v284_v9 = vld [vmem:[%s3859_s2 + $0x20] sm:$0xff]  ;;  %vm378_vm1 = vcmask 31744   ;;  %v287_v12 = vld [vmem:[%s3859_s2 + $0x38] sm:$0xff]  ;;  %s2372_s12 = sld [smem:[#allocation2]] }
  0x10   : > { %308 = vperm.xlu1 %2591, %v282_v0   ;;  %298 = vperm.xlu0 %2590, %v280_v1   ;;  %s3898_s20 = smov (!%p245_p4, %s2607_s20), 1  ;;  %v285_v8 = vld [vmem:[%s3859_s2 + $0x28] sm:$0xff]  ;;  %v264_v10 = vld [vmem:[%s3858_s1] sm:$0xff]  ;;  %v286_v13 = vld [vmem:[%s3859_s2 + $0x30] sm:$0xff] }
  0x11   : > { %496 = vmatprep.mubr.f32.mxu0 %v2618_v5  ;;  %1021 = vmatprep.mubr.f32.mxu1 %v2618_v5  ;;  %s2562_s6 = sshll.u32 %s3898_s20, 3  ;;  %v797_v11 = vld [vmem:[%s3858_s1 + $0x80] sm:$0xff]  ;;  %v265_v14 = vld [vmem:[%s3858_s1 + $0x8] sm:$0xff]  ;;  %v266_v18 = vld [vmem:[%s3858_s1 + $0x10] sm:$0xff]  ;;  %s2487_s13 = sshll.u32 %s3898_s20, 1 }
  0x12   : > { %s252_s9 = scalar_lea.vmem %s3857_s0, %s2562_s6  ;;  %v798_v15 = vld [vmem:[%s3858_s1 + $0x88] sm:$0xff]  ;;  %v288_v17 = vld [vmem:[%s3859_s2 + $0x40] sm:$0xff]  ;;  %v799_v19 = vld [vmem:[%s3858_s1 + $0x90] sm:$0xff]  ;;  %s261_s16 = scalar_lea.vmem %s3862_s5, %s2487_s13 }
  0x13   : > { %v263_v6 = vld [vmem:[%s252_s9] sm:$0xff]  ;;  %v289_v16 = vld [vmem:[%s3859_s2 + $0x48] sm:$0xff]  ;;  %v291_v20 = vld [vmem:[%s3859_s2 + $0x58] sm:$0xff] }
  0x14   : > { %313 = vperm.xlu1 %2591, %v283_v3   ;;  %303 = vperm.xlu0 %2590, %v281_v4   ;;  %v377_v7 = vcombine.high %v263_v6, %v263_v6  ;;  %v290_v21 = vld [vmem:[%s3859_s2 + $0x50] sm:$0xff]  ;;  %v267_v22 = vld [vmem:[%s3858_s1 + $0x18] sm:$0xff]  ;;  %v293_v24 = vld [vmem:[%s3859_s2 + $0x68] sm:$0xff] }
  0x15   : > { %v800_v23 = vld [vmem:[%s3858_s1 + $0x98] sm:$0xff]  ;;  %v292_v25 = vld [vmem:[%s3859_s2 + $0x60] sm:$0xff]  ;;  %v294_v29 = vld [vmem:[%s3859_s2 + $0x70] sm:$0xff] }
  0x16   : > { %2488 = vmatprep.subr.msk.mxu0 %vm427_vm0, %v377_v7  ;;  %2506 = vmatprep.subr.msk.mxu1 %vm427_vm0, %v377_v7  ;;  %v268_v26 = vld [vmem:[%s3858_s1 + $0x20] sm:$0xff]  ;;  %v295_v28 = vld [vmem:[%s3859_s2 + $0x78] sm:$0xff]  ;;  %v269_v30 = vld [vmem:[%s3858_s1 + $0x28] sm:$0xff] }
  0x17   : > { %2489 = vmatpush1.msk.msra.mxu0 %vm427_vm0, %v263_v6  ;;  %2507 = vmatpush1.msk.msra.mxu1 %vm427_vm0, %v263_v6  ;;  %v801_v27 = vld [vmem:[%s3858_s1 + $0xa0] sm:$0xff]  ;;  %v802_v31 = vld [vmem:[%s3858_s1 + $0xa8] sm:$0xff]  ;;  %v270_v34 = vld [vmem:[%s3858_s1 + $0x30] sm:$0xff] }
  0x18   : > { %323 = vperm.xlu1 %2591, %v285_v8   ;;  %318 = vperm.xlu0 %2590, %v284_v9   ;;  %v626_v32 = vld [vmem:[%s3860_s3 + $0x8] sm:$0xff]  ;;  %v625_v33 = vld [vmem:[%s3860_s3] sm:$0xff]  ;;  %v803_v35 = vld [vmem:[%s3858_s1 + $0xb0] sm:$0xff] }
  0x19   : > { %2490 = vmatmul.mubr.msk.f32.vlgmr.msra.gmra.mrb[0].mxu0 %vm378_vm1, %v264_v10  ;;  %2508 = vmatmul.mubr.msk.f32.vlgmr.msra.gmra.mrb[0].mxu1 %vm378_vm1, %v797_v11  ;;  %v628_v36 = vld [vmem:[%s3860_s3 + $0x18] sm:$0xff]  ;;  %v627_v37 = vld [vmem:[%s3860_s3 + $0x10] sm:$0xff]  ;;  %v630_v40 = vld [vmem:[%s3860_s3 + $0x28] sm:$0xff] }
  0x1a   : > { %502 = vmatprep.mubr.f32.mxu0 %v2618_v5  ;;  %1027 = vmatprep.mubr.f32.mxu1 %v2618_v5  ;;  %v271_v38 = vld [vmem:[%s3858_s1 + $0x38] sm:$0xff]  ;;  %v629_v41 = vld [vmem:[%s3860_s3 + $0x20] sm:$0xff]  ;;  %v631_v45 = vld [vmem:[%s3860_s3 + $0x30] sm:$0xff] }
  0x1b   : > { %2524 = vmatprep.subr.msk.mxu0 %vm427_vm0, %v377_v7  ;;  %2542 = vmatprep.subr.msk.mxu1 %vm427_vm0, %v377_v7  ;;  %v804_v39 = vld [vmem:[%s3858_s1 + $0xb8] sm:$0xff]  ;;  %v272_v42 = vld [vmem:[%s3858_s1 + $0x40] sm:$0xff]  ;;  %v273_v46 = vld [vmem:[%s3858_s1 + $0x48] sm:$0xff] }
  0x1c   : > { %333 = vperm.xlu1 %2591, %v287_v12   ;;  %328 = vperm.xlu0 %2590, %v286_v13   ;;  %v805_v43 = vld [vmem:[%s3858_s1 + $0xc0] sm:$0xff]  ;;  %v632_v44 = vld [vmem:[%s3860_s3 + $0x38] sm:$0xff]  ;;  %v806_v47 = vld [vmem:[%s3858_s1 + $0xc8] sm:$0xff] }
  0x1d   : > { %2491 = vmatmul.mubr.msk.f32.gmra.mrb[2].mxu0 %vm378_vm1, %v265_v14  ;;  %2509 = vmatmul.mubr.msk.f32.gmra.mrb[2].mxu1 %vm378_vm1, %v798_v15  ;;  %v634_v48 = vld [vmem:[%s3860_s3 + $0x48] sm:$0xff]  ;;  %v633_v49 = vld [vmem:[%s3860_s3 + $0x40] sm:$0xff]  ;;  %v274_v50 = vld [vmem:[%s3858_s1 + $0x50] sm:$0xff] }
  0x1e   : > { %508 = vmatprep.mubr.f32.mxu0 %v2618_v5  ;;  %1033 = vmatprep.mubr.f32.mxu1 %v2618_v5  ;;  %v807_v51 = vld [vmem:[%s3858_s1 + $0xd0] sm:$0xff]  ;;  %v636_v52 = vld [vmem:[%s3860_s3 + $0x58] sm:$0xff]  ;;  %v638_v56 = vld [vmem:[%s3860_s3 + $0x68] sm:$0xff] }
  0x1f   : > { %2525 = vmatpush1.msk.msra.mxu0 %vm427_vm0, %v263_v6  ;;  %2543 = vmatpush1.msk.msra.mxu1 %vm427_vm0, %v263_v6  ;;  %v635_v53 = vld [vmem:[%s3860_s3 + $0x50] sm:$0xff]  ;;  %v275_v54 = vld [vmem:[%s3858_s1 + $0x58] sm:$0xff]  ;;  %v637_v57 = vld [vmem:[%s3860_s3 + $0x60] sm:$0xff] }
  0x20   : > { %343 = vperm.xlu1 %2591, %v289_v16   ;;  %338 = vperm.xlu0 %2590, %v288_v17   ;;  %v808_v55 = vld [vmem:[%s3858_s1 + $0xd8] sm:$0xff]  ;;  %v276_v58 = vld [vmem:[%s3858_s1 + $0x60] sm:$0xff]  ;;  %v639_v61 = vld [vmem:[%s3860_s3 + $0x70] sm:$0xff] }
  0x21   : > { %2492 = vmatmul.mubr.msk.f32.gmra.mrb[4].mxu0 %vm378_vm1, %v266_v18  ;;  %2510 = vmatmul.mubr.msk.f32.gmra.mrb[4].mxu1 %vm378_vm1, %v799_v19  ;;  %v809_v59 = vld [vmem:[%s3858_s1 + $0xe0] sm:$0xff]  ;;  %v640_v60 = vld [vmem:[%s3860_s3 + $0x78] sm:$0xff]  ;;  %v277_v62 = vld [vmem:[%s3858_s1 + $0x68] sm:$0xff] }
  0x22   : > { %514 = vmatprep.mubr.f32.mxu0 %v2618_v5  ;;  %1039 = vmatprep.mubr.f32.mxu1 %v2618_v5  ;;  %v810_v63 = vld [vmem:[%s3858_s1 + $0xe8] sm:$0xff]  ;;  %v813_v1 = vld [vmem:[%s3859_s2 + $0x80] sm:$0xff]  ;;  %v278_v2 = vld [vmem:[%s3858_s1 + $0x70] sm:$0xff] }
  0x23   : > { %v814_v0 = vld [vmem:[%s3859_s2 + $0x88] sm:$0xff]  ;;  %v811_v3 = vld [vmem:[%s3858_s1 + $0xf0] sm:$0xff]  ;;  %v816_v4 = vld [vmem:[%s3859_s2 + $0x98] sm:$0xff] }
  0x24   : > { %353 = vperm.xlu1 %2591, %v291_v20   ;;  %348 = vperm.xlu0 %2590, %v290_v21   ;;  %v815_v6 = vld [vmem:[%s3859_s2 + $0x90] sm:$0xff]  ;;  %v279_v7 = vld [vmem:[%s3858_s1 + $0x78] sm:$0xff]  ;;  %v818_v9 = vld [vmem:[%s3859_s2 + $0xa8] sm:$0xff] }
  0x25   : > { %2493 = vmatmul.mubr.msk.f32.gmra.mrb[6].mxu0 %vm378_vm1, %v267_v22  ;;  %2511 = vmatmul.mubr.msk.f32.gmra.mrb[6].mxu1 %vm378_vm1, %v800_v23  ;;  %v812_v8 = vld [vmem:[%s3858_s1 + $0xf8] sm:$0xff]  ;;  %v817_v10 = vld [vmem:[%s3859_s2 + $0xa0] sm:$0xff]  ;;  %v819_v14 = vld [vmem:[%s3859_s2 + $0xb0] sm:$0xff] }
  0x26   : > { %520 = vmatprep.mubr.f32.mxu0 %v2618_v5  ;;  %1045 = vmatprep.mubr.f32.mxu1 %v2618_v5  ;;  %v1322_v11 = vld [vmem:[%s3858_s1 + $0x100] sm:$0xff]  ;;  %v820_v13 = vld [vmem:[%s3859_s2 + $0xb8] sm:$0xff]  ;;  %v1323_v15 = vld [vmem:[%s3858_s1 + $0x108] sm:$0xff] }
  0x27   : > { %v1847_v12 = vld [vmem:[%s3858_s1 + $0x180] sm:$0xff]  ;;  %v1848_v16 = vld [vmem:[%s3858_s1 + $0x188] sm:$0xff]  ;;  %v1324_v19 = vld [vmem:[%s3858_s1 + $0x110] sm:$0xff] }
  0x28   : > { %363 = vperm.xlu1 %2591, %v293_v24   ;;  %358 = vperm.xlu0 %2590, %v292_v25   ;;  %v822_v17 = vld [vmem:[%s3859_s2 + $0xc8] sm:$0xff]  ;;  %v821_v18 = vld [vmem:[%s3859_s2 + $0xc0] sm:$0xff]  ;;  %v1849_v20 = vld [vmem:[%s3858_s1 + $0x190] sm:$0xff] }
  0x29   : > { %2494 = vmatmul.mubr.msk.f32.gmra.mrb[8].mxu0 %vm378_vm1, %v268_v26  ;;  %2512 = vmatmul.mubr.msk.f32.gmra.mrb[8].mxu1 %vm378_vm1, %v801_v27  ;;  %v824_v21 = vld [vmem:[%s3859_s2 + $0xd8] sm:$0xff]  ;;  %v823_v22 = vld [vmem:[%s3859_s2 + $0xd0] sm:$0xff]  ;;  %v826_v25 = vld [vmem:[%s3859_s2 + $0xe8] sm:$0xff] }
  0x2a   : > { %526 = vmatprep.mubr.f32.mxu0 %v2618_v5  ;;  %1051 = vmatprep.mubr.f32.mxu1 %v2618_v5  ;;  %v1325_v23 = vld [vmem:[%s3858_s1 + $0x118] sm:$0xff]  ;;  %v825_v26 = vld [vmem:[%s3859_s2 + $0xe0] sm:$0xff] }
  0x2b   : > { %v1850_v24 = vld [vmem:[%s3858_s1 + $0x198] sm:$0xff]  ;;  %v1326_v27 = vld [vmem:[%s3858_s1 + $0x120] sm:$0xff] }
  0x2c   : > { %373 = vperm.xlu1 %2591, %v295_v28   ;;  %368 = vperm.xlu0 %2590, %v294_v29   ;;  %v1851_v28 = vld [vmem:[%s3858_s1 + $0x1a0] sm:$0xff]  ;;  %v828_v29 = vld [vmem:[%s3859_s2 + $0xf8] sm:$0xff] }
  0x2d   : > { %2495 = vmatmul.mubr.msk.f32.gmra.mrb[10].mxu0 %vm378_vm1, %v269_v30  ;;  %2513 = vmatmul.mubr.msk.f32.gmra.mrb[10].mxu1 %vm378_vm1, %v802_v31  ;;  %v827_v30 = vld [vmem:[%s3859_s2 + $0xf0] sm:$0xff]  ;;  %v1327_v31 = vld [vmem:[%s3858_s1 + $0x128] sm:$0xff] }
  0x2e   : > { %532 = vmatprep.mubr.f32.mxu0 %v2618_v5  ;;  %1057 = vmatprep.mubr.f32.mxu1 %v2618_v5 }
  0x30   : > { %648 = vperm.xlu1 %2591, %v626_v32   ;;  %643 = vperm.xlu0 %2590, %v625_v33   ;;  %v1852_v32 = vld [vmem:[%s3858_s1 + $0x1a8] sm:$0xff] }
  0x31   : > { %2496 = vmatmul.mubr.msk.f32.gmra.mrb[12].mxu0 %vm378_vm1, %v270_v34  ;;  %2514 = vmatmul.mubr.msk.f32.gmra.mrb[12].mxu1 %vm378_vm1, %v803_v35  ;;  %v1151_v33 = vld [vmem:[%s3860_s3 + $0x88] sm:$0xff]  ;;  %v1150_v34 = vld [vmem:[%s3860_s3 + $0x80] sm:$0xff]  ;;  %v1328_v35 = vld [vmem:[%s3858_s1 + $0x130] sm:$0xff] }
  0x32   : > { %538 = vmatprep.mubr.f32.mxu0 %v2618_v5  ;;  %1063 = vmatprep.mubr.f32.mxu1 %v2618_v5 }
  0x34   : > { %658 = vperm.xlu1 %2591, %v628_v36   ;;  %653 = vperm.xlu0 %2590, %v627_v37   ;;  %v1853_v36 = vld [vmem:[%s3858_s1 + $0x1b0] sm:$0xff]  ;;  %v1153_v37 = vld [vmem:[%s3860_s3 + $0x98] sm:$0xff] }
  0x35   : > { %2497 = vmatmul.mubr.msk.f32.gmra.mrb[14].mxu0 %vm378_vm1, %v271_v38  ;;  %2515 = vmatmul.mubr.msk.f32.gmra.mrb[14].mxu1 %vm378_vm1, %v804_v39  ;;  %v1152_v38 = vld [vmem:[%s3860_s3 + $0x90] sm:$0xff]  ;;  %v1329_v39 = vld [vmem:[%s3858_s1 + $0x138] sm:$0xff] }
  0x36   : > { %544 = vmatprep.mubr.f32.mxu0 %v2618_v5  ;;  %1069 = vmatprep.mubr.f32.mxu1 %v2618_v5 }
  0x38   : > { %668 = vperm.xlu1 %2591, %v630_v40   ;;  %663 = vperm.xlu0 %2590, %v629_v41   ;;  %v1854_v40 = vld [vmem:[%s3858_s1 + $0x1b8] sm:$0xff]  ;;  %v1155_v41 = vld [vmem:[%s3860_s3 + $0xa8] sm:$0xff] }
  0x39   : > { %2498 = vmatmul.mubr.msk.f32.gmra.mrb[16].mxu0 %vm378_vm1, %v272_v42  ;;  %2516 = vmatmul.mubr.msk.f32.gmra.mrb[16].mxu1 %vm378_vm1, %v805_v43  ;;  %v1154_v42 = vld [vmem:[%s3860_s3 + $0xa0] sm:$0xff] }
  0x3a   : > { %550 = vmatprep.mubr.f32.mxu0 %v2618_v5  ;;  %1075 = vmatprep.mubr.f32.mxu1 %v2618_v5  ;;  %v1330_v43 = vld [vmem:[%s3858_s1 + $0x140] sm:$0xff] }
  0x3c   : > { %678 = vperm.xlu1 %2591, %v632_v44   ;;  %673 = vperm.xlu0 %2590, %v631_v45   ;;  %v1855_v44 = vld [vmem:[%s3858_s1 + $0x1c0] sm:$0xff]  ;;  %v1157_v45 = vld [vmem:[%s3860_s3 + $0xb8] sm:$0xff] }
  0x3d   : > { %2499 = vmatmul.mubr.msk.f32.gmra.mrb[18].mxu0 %vm378_vm1, %v273_v46  ;;  %2517 = vmatmul.mubr.msk.f32.gmra.mrb[18].mxu1 %vm378_vm1, %v806_v47  ;;  %v1156_v46 = vld [vmem:[%s3860_s3 + $0xb0] sm:$0xff]  ;;  %v1331_v47 = vld [vmem:[%s3858_s1 + $0x148] sm:$0xff] }
  0x3e   : > { %556 = vmatprep.mubr.f32.mxu0 %v2618_v5  ;;  %1081 = vmatprep.mubr.f32.mxu1 %v2618_v5 }
  0x40   : > { %688 = vperm.xlu1 %2591, %v634_v48   ;;  %683 = vperm.xlu0 %2590, %v633_v49   ;;  %v1856_v48 = vld [vmem:[%s3858_s1 + $0x1c8] sm:$0xff] }
  0x41   : > { %2500 = vmatmul.mubr.msk.f32.gmra.mrb[20].mxu0 %vm378_vm1, %v274_v50  ;;  %2518 = vmatmul.mubr.msk.f32.gmra.mrb[20].mxu1 %vm378_vm1, %v807_v51  ;;  %v1159_v49 = vld [vmem:[%s3860_s3 + $0xc8] sm:$0xff]  ;;  %v1158_v50 = vld [vmem:[%s3860_s3 + $0xc0] sm:$0xff]  ;;  %v1332_v51 = vld [vmem:[%s3858_s1 + $0x150] sm:$0xff] }
  0x42   : > { %562 = vmatprep.mubr.f32.mxu0 %v2618_v5  ;;  %1087 = vmatprep.mubr.f32.mxu1 %v2618_v5 }
  0x44   : > { %698 = vperm.xlu1 %2591, %v636_v52   ;;  %693 = vperm.xlu0 %2590, %v635_v53   ;;  %v1857_v52 = vld [vmem:[%s3858_s1 + $0x1d0] sm:$0xff]  ;;  %v1161_v53 = vld [vmem:[%s3860_s3 + $0xd8] sm:$0xff] }
  0x45   : > { %2501 = vmatmul.mubr.msk.f32.gmra.mrb[22].mxu0 %vm378_vm1, %v275_v54  ;;  %2519 = vmatmul.mubr.msk.f32.gmra.mrb[22].mxu1 %vm378_vm1, %v808_v55  ;;  %v1160_v54 = vld [vmem:[%s3860_s3 + $0xd0] sm:$0xff]  ;;  %v1333_v55 = vld [vmem:[%s3858_s1 + $0x158] sm:$0xff] }
  0x46   : > { %568 = vmatprep.mubr.f32.mxu0 %v2618_v5  ;;  %1093 = vmatprep.mubr.f32.mxu1 %v2618_v5 }
  0x48   : > { %708 = vperm.xlu1 %2591, %v638_v56   ;;  %703 = vperm.xlu0 %2590, %v637_v57   ;;  %v1858_v56 = vld [vmem:[%s3858_s1 + $0x1d8] sm:$0xff]  ;;  %v1163_v57 = vld [vmem:[%s3860_s3 + $0xe8] sm:$0xff] }
  0x49   : > { %2502 = vmatmul.mubr.msk.f32.gmra.mrb[24].mxu0 %vm378_vm1, %v276_v58  ;;  %2520 = vmatmul.mubr.msk.f32.gmra.mrb[24].mxu1 %vm378_vm1, %v809_v59  ;;  %v1162_v58 = vld [vmem:[%s3860_s3 + $0xe0] sm:$0xff] }
  0x4a   : > { %574 = vmatprep.mubr.f32.mxu0 %v2618_v5  ;;  %1099 = vmatprep.mubr.f32.mxu1 %v2618_v5  ;;  %v1334_v59 = vld [vmem:[%s3858_s1 + $0x160] sm:$0xff] }
  0x4c   : > { %718 = vperm.xlu1 %2591, %v640_v60   ;;  %713 = vperm.xlu0 %2590, %v639_v61   ;;  %v1859_v60 = vld [vmem:[%s3858_s1 + $0x1e0] sm:$0xff]  ;;  %v1165_v61 = vld [vmem:[%s3860_s3 + $0xf8] sm:$0xff] }
  0x4d   : > { %2503 = vmatmul.mubr.msk.f32.gmra.mrb[26].mxu0 %vm378_vm1, %v277_v62  ;;  %2521 = vmatmul.mubr.msk.f32.gmra.mrb[26].mxu1 %vm378_vm1, %v810_v63  ;;  %v1164_v62 = vld [vmem:[%s3860_s3 + $0xf0] sm:$0xff]  ;;  %v1335_v63 = vld [vmem:[%s3858_s1 + $0x168] sm:$0xff] }
  0x4e   : > { %580 = vmatprep.mubr.f32.mxu0 %v2618_v5  ;;  %1105 = vmatprep.mubr.f32.mxu1 %v2618_v5 }
  0x50   : > { %836 = vperm.xlu1 %2591, %v814_v0   ;;  %831 = vperm.xlu0 %2590, %v813_v1   ;;  %v1860_v0 = vld [vmem:[%s3858_s1 + $0x1e8] sm:$0xff] }
  0x51   : > { %2504 = vmatmul.mubr.msk.f32.gmra.mrb[28].mxu0 %vm378_vm1, %v278_v2  ;;  %2522 = vmatmul.mubr.msk.f32.gmra.mrb[28].mxu1 %vm378_vm1, %v811_v3  ;;  %v1339_v1 = vld [vmem:[%s3859_s2 + $0x108] sm:$0xff]  ;;  %v1338_v2 = vld [vmem:[%s3859_s2 + $0x100] sm:$0xff] }
  0x52   : > { %586 = vmatprep.mubr.f32.mxu0 %v2618_v5  ;;  %1111 = vmatprep.mubr.f32.mxu1 %v2618_v5 }
  0x54   : > { %846 = vperm.xlu1 %2591, %v816_v4   ;;  %841 = vperm.xlu0 %2590, %v815_v6   ;;  %v1336_v6 = vld [vmem:[%s3858_s1 + $0x170] sm:$0xff] }
  0x55   : > { %2505 = vmatmul.mubr.msk.f32.gmra.mrb[30].mxu0 %vm378_vm1, %v279_v7  ;;  %2523 = vmatmul.mubr.msk.f32.gmra.mrb[30].mxu1 %vm378_vm1, %v812_v8  ;;  %v1861_v7 = vld [vmem:[%s3858_s1 + $0x1f0] sm:$0xff]  ;;  %v1341_v8 = vld [vmem:[%s3859_s2 + $0x118] sm:$0xff] }
  0x56   : > { %1546 = vmatprep.mubr.f32.mxu0 %v2618_v5  ;;  %2071 = vmatprep.mubr.f32.mxu1 %v2618_v5 }
  0x58   : > { %856 = vperm.xlu1 %2591, %v818_v9   ;;  %851 = vperm.xlu0 %2590, %v817_v10   ;;  %v1340_v9 = vld [vmem:[%s3859_s2 + $0x110] sm:$0xff] }
  0x59   : > { %2526 = vmatmul.mubr.msk.f32.vlgmr.msra.gmra.mrb[32].mxu0 %vm378_vm1, %v1322_v11  ;;  %2544 = vmatmul.mubr.msk.f32.vlgmr.msra.gmra.mrb[32].mxu1 %vm378_vm1, %v1847_v12  ;;  %v1337_v12 = vld [vmem:[%s3858_s1 + $0x178] sm:$0xff] }
  0x5a   : > { %1552 = vmatprep.mubr.f32.mxu0 %v2618_v5  ;;  %2077 = vmatprep.mubr.f32.mxu1 %v2618_v5 }
  0x5c   : > { %866 = vperm.xlu1 %2591, %v820_v13   ;;  %861 = vperm.xlu0 %2590, %v819_v14   ;;  %v1862_v13 = vld [vmem:[%s3858_s1 + $0x1f8] sm:$0xff]  ;;  %v1343_v14 = vld [vmem:[%s3859_s2 + $0x128] sm:$0xff] }
  0x5d   : > { %2527 = vmatmul.mubr.msk.f32.gmra.mrb[34].mxu0 %vm378_vm1, %v1323_v15  ;;  %2545 = vmatmul.mubr.msk.f32.gmra.mrb[34].mxu1 %vm378_vm1, %v1848_v16  ;;  %v1342_v15 = vld [vmem:[%s3859_s2 + $0x120] sm:$0xff] }
  0x5e   : > { %1558 = vmatprep.mubr.f32.mxu0 %v2618_v5  ;;  %2083 = vmatprep.mubr.f32.mxu1 %v2618_v5 }
  0x60   : > { %876 = vperm.xlu1 %2591, %v822_v17   ;;  %871 = vperm.xlu0 %2590, %v821_v18   ;;  %v1345_v17 = vld [vmem:[%s3859_s2 + $0x138] sm:$0xff]  ;;  %v1344_v18 = vld [vmem:[%s3859_s2 + $0x130] sm:$0xff] }
  0x61   : > { %2528 = vmatmul.mubr.msk.f32.gmra.mrb[36].mxu0 %vm378_vm1, %v1324_v19  ;;  %2546 = vmatmul.mubr.msk.f32.gmra.mrb[36].mxu1 %vm378_vm1, %v1849_v20 }
  0x62   : > { %1564 = vmatprep.mubr.f32.mxu0 %v2618_v5  ;;  %2089 = vmatprep.mubr.f32.mxu1 %v2618_v5 }
  0x64   : > { %886 = vperm.xlu1 %2591, %v824_v21   ;;  %881 = vperm.xlu0 %2590, %v823_v22   ;;  %v1347_v21 = vld [vmem:[%s3859_s2 + $0x148] sm:$0xff]  ;;  %v1346_v22 = vld [vmem:[%s3859_s2 + $0x140] sm:$0xff] }
  0x65   : > { %2529 = vmatmul.mubr.msk.f32.gmra.mrb[38].mxu0 %vm378_vm1, %v1325_v23  ;;  %2547 = vmatmul.mubr.msk.f32.gmra.mrb[38].mxu1 %vm378_vm1, %v1850_v24 }
  0x66   : > { %1570 = vmatprep.mubr.f32.mxu0 %v2618_v5  ;;  %2095 = vmatprep.mubr.f32.mxu1 %v2618_v5 }
  0x68   : > { %896 = vperm.xlu1 %2591, %v826_v25   ;;  %891 = vperm.xlu0 %2590, %v825_v26   ;;  %v1349_v25 = vld [vmem:[%s3859_s2 + $0x158] sm:$0xff]  ;;  %v1348_v26 = vld [vmem:[%s3859_s2 + $0x150] sm:$0xff] }
  0x69   : > { %2530 = vmatmul.mubr.msk.f32.gmra.mrb[40].mxu0 %vm378_vm1, %v1326_v27  ;;  %2548 = vmatmul.mubr.msk.f32.gmra.mrb[40].mxu1 %vm378_vm1, %v1851_v28 }
  0x6a   : > { %1576 = vmatprep.mubr.f32.mxu0 %v2618_v5  ;;  %2101 = vmatprep.mubr.f32.mxu1 %v2618_v5 }
  0x6c   : > { %906 = vperm.xlu1 %2591, %v828_v29   ;;  %901 = vperm.xlu0 %2590, %v827_v30   ;;  %v1351_v29 = vld [vmem:[%s3859_s2 + $0x168] sm:$0xff]  ;;  %v1350_v30 = vld [vmem:[%s3859_s2 + $0x160] sm:$0xff] }
  0x6d   : > { %2531 = vmatmul.mubr.msk.f32.gmra.mrb[42].mxu0 %vm378_vm1, %v1327_v31  ;;  %2549 = vmatmul.mubr.msk.f32.gmra.mrb[42].mxu1 %vm378_vm1, %v1852_v32 }
  0x6e   : > { %1582 = vmatprep.mubr.f32.mxu0 %v2618_v5  ;;  %2107 = vmatprep.mubr.f32.mxu1 %v2618_v5 }
  0x70   : > { %1173 = vperm.xlu1 %2591, %v1151_v33   ;;  %1168 = vperm.xlu0 %2590, %v1150_v34   ;;  %v1353_v33 = vld [vmem:[%s3859_s2 + $0x178] sm:$0xff]  ;;  %v1352_v34 = vld [vmem:[%s3859_s2 + $0x170] sm:$0xff] }
  0x71   : > { %2532 = vmatmul.mubr.msk.f32.gmra.mrb[44].mxu0 %vm378_vm1, %v1328_v35  ;;  %2550 = vmatmul.mubr.msk.f32.gmra.mrb[44].mxu1 %vm378_vm1, %v1853_v36 }
  0x72   : > { %1588 = vmatprep.mubr.f32.mxu0 %v2618_v5  ;;  %2113 = vmatprep.mubr.f32.mxu1 %v2618_v5 }
  0x74   : > { %1183 = vperm.xlu1 %2591, %v1153_v37   ;;  %1178 = vperm.xlu0 %2590, %v1152_v38   ;;  %v1676_v37 = vld [vmem:[%s3860_s3 + $0x108] sm:$0xff]  ;;  %v1675_v38 = vld [vmem:[%s3860_s3 + $0x100] sm:$0xff] }
  0x75   : > { %2533 = vmatmul.mubr.msk.f32.gmra.mrb[46].mxu0 %vm378_vm1, %v1329_v39  ;;  %2551 = vmatmul.mubr.msk.f32.gmra.mrb[46].mxu1 %vm378_vm1, %v1854_v40 }
  0x76   : > { %1594 = vmatprep.mubr.f32.mxu0 %v2618_v5  ;;  %2119 = vmatprep.mubr.f32.mxu1 %v2618_v5 }
  0x78   : > { %1193 = vperm.xlu1 %2591, %v1155_v41   ;;  %1188 = vperm.xlu0 %2590, %v1154_v42   ;;  %v1678_v41 = vld [vmem:[%s3860_s3 + $0x118] sm:$0xff]  ;;  %v1677_v42 = vld [vmem:[%s3860_s3 + $0x110] sm:$0xff] }
  0x79   : > { %2534 = vmatmul.mubr.msk.f32.gmra.mrb[48].mxu0 %vm378_vm1, %v1330_v43  ;;  %2552 = vmatmul.mubr.msk.f32.gmra.mrb[48].mxu1 %vm378_vm1, %v1855_v44 }
  0x7a   : > { %1600 = vmatprep.mubr.f32.mxu0 %v2618_v5  ;;  %2125 = vmatprep.mubr.f32.mxu1 %v2618_v5 }
  0x7c   : > { %1203 = vperm.xlu1 %2591, %v1157_v45   ;;  %1198 = vperm.xlu0 %2590, %v1156_v46   ;;  %v1680_v45 = vld [vmem:[%s3860_s3 + $0x128] sm:$0xff]  ;;  %v1679_v46 = vld [vmem:[%s3860_s3 + $0x120] sm:$0xff] }
  0x7d   : > { %2535 = vmatmul.mubr.msk.f32.gmra.mrb[50].mxu0 %vm378_vm1, %v1331_v47  ;;  %2553 = vmatmul.mubr.msk.f32.gmra.mrb[50].mxu1 %vm378_vm1, %v1856_v48 }
  0x7e   : > { %1606 = vmatprep.mubr.f32.mxu0 %v2618_v5  ;;  %2131 = vmatprep.mubr.f32.mxu1 %v2618_v5 }
  0x80   : > { %1213 = vperm.xlu1 %2591, %v1159_v49   ;;  %1208 = vperm.xlu0 %2590, %v1158_v50   ;;  %v1682_v49 = vld [vmem:[%s3860_s3 + $0x138] sm:$0xff]  ;;  %v1681_v50 = vld [vmem:[%s3860_s3 + $0x130] sm:$0xff] }
  0x81   : > { %2536 = vmatmul.mubr.msk.f32.gmra.mrb[52].mxu0 %vm378_vm1, %v1332_v51  ;;  %2554 = vmatmul.mubr.msk.f32.gmra.mrb[52].mxu1 %vm378_vm1, %v1857_v52 }
  0x82   : > { %1612 = vmatprep.mubr.f32.mxu0 %v2618_v5  ;;  %2137 = vmatprep.mubr.f32.mxu1 %v2618_v5 }
  0x84   : > { %1223 = vperm.xlu1 %2591, %v1161_v53   ;;  %1218 = vperm.xlu0 %2590, %v1160_v54   ;;  %v1684_v53 = vld [vmem:[%s3860_s3 + $0x148] sm:$0xff]  ;;  %v1683_v54 = vld [vmem:[%s3860_s3 + $0x140] sm:$0xff] }
  0x85   : > { %2537 = vmatmul.mubr.msk.f32.gmra.mrb[54].mxu0 %vm378_vm1, %v1333_v55  ;;  %2555 = vmatmul.mubr.msk.f32.gmra.mrb[54].mxu1 %vm378_vm1, %v1858_v56 }
  0x86   : > { %1618 = vmatprep.mubr.f32.mxu0 %v2618_v5  ;;  %2143 = vmatprep.mubr.f32.mxu1 %v2618_v5 }
  0x88   : > { %1233 = vperm.xlu1 %2591, %v1163_v57   ;;  %1228 = vperm.xlu0 %2590, %v1162_v58   ;;  %v1686_v57 = vld [vmem:[%s3860_s3 + $0x158] sm:$0xff]  ;;  %v1685_v58 = vld [vmem:[%s3860_s3 + $0x150] sm:$0xff] }
  0x89   : > { %2538 = vmatmul.mubr.msk.f32.gmra.mrb[56].mxu0 %vm378_vm1, %v1334_v59  ;;  %2556 = vmatmul.mubr.msk.f32.gmra.mrb[56].mxu1 %vm378_vm1, %v1859_v60 }
  0x8a   : > { %1624 = vmatprep.mubr.f32.mxu0 %v2618_v5  ;;  %2149 = vmatprep.mubr.f32.mxu1 %v2618_v5 }
  0x8c   : > { %1243 = vperm.xlu1 %2591, %v1165_v61   ;;  %1238 = vperm.xlu0 %2590, %v1164_v62   ;;  %v1688_v61 = vld [vmem:[%s3860_s3 + $0x168] sm:$0xff]  ;;  %v1687_v62 = vld [vmem:[%s3860_s3 + $0x160] sm:$0xff] }
  0x8d   : > { %2539 = vmatmul.mubr.msk.f32.gmra.mrb[58].mxu0 %vm378_vm1, %v1335_v63  ;;  %2557 = vmatmul.mubr.msk.f32.gmra.mrb[58].mxu1 %vm378_vm1, %v1860_v0 }
  0x8e   : > { %1630 = vmatprep.mubr.f32.mxu0 %v2618_v5  ;;  %2155 = vmatprep.mubr.f32.mxu1 %v2618_v5 }
  0x8f   : > { %v3183_v3 = vpop.permute.xlu1 %308  ;;  %v3185_v4 = vpop.permute.xlu0 %298 }
  0x90   : > { %1361 = vperm.xlu1 %2591, %v1339_v1   ;;  %1356 = vperm.xlu0 %2590, %v1338_v2   ;;  %v1690_v1 = vld [vmem:[%s3860_s3 + $0x178] sm:$0xff]  ;;  %v1689_v2 = vld [vmem:[%s3860_s3 + $0x170] sm:$0xff] }
  0x91   : > { %2540 = vmatmul.mubr.msk.f32.gmra.mrb[60].mxu0 %vm378_vm1, %v1336_v6  ;;  %2558 = vmatmul.mubr.msk.f32.gmra.mrb[60].mxu1 %vm378_vm1, %v1861_v7 }
  0x92   : > { %1636 = vmatprep.mubr.f32.mxu0 %v2618_v5  ;;  %2161 = vmatprep.mubr.f32.mxu1 %v2618_v5 }
  0x93   : > { %v3203_v10 = vpop.permute.xlu1 %313  ;;  %v3205_v11 = vpop.permute.xlu0 %303 }
  0x94   : > { %1371 = vperm.xlu1 %2591, %v1341_v8   ;;  %1366 = vperm.xlu0 %2590, %v1340_v9   ;;  %v1864_v8 = vld [vmem:[%s3859_s2 + $0x188] sm:$0xff]  ;;  %v1863_v9 = vld [vmem:[%s3859_s2 + $0x180] sm:$0xff] }
  0x95   : > { %2541 = vmatmul.mubr.msk.f32.gmra.mrb[62].mxu0 %vm378_vm1, %v1337_v12  ;;  %2559 = vmatmul.mubr.msk.f32.gmra.mrb[62].mxu1 %vm378_vm1, %v1862_v13 }
  0x97   : > { %v3223_v16 = vpop.permute.xlu1 %323  ;;  %v3225_v5 = vpop.permute.xlu0 %318 }
  0x98   : > { %1381 = vperm.xlu1 %2591, %v1343_v14   ;;  %1376 = vperm.xlu0 %2590, %v1342_v15   ;;  %v1866_v14 = vld [vmem:[%s3859_s2 + $0x198] sm:$0xff]  ;;  %v1865_v15 = vld [vmem:[%s3859_s2 + $0x190] sm:$0xff] }
  0x9b   : > { %v3233_v19 = vpop.permute.xlu1 %333  ;;  %v3235_v20 = vpop.permute.xlu0 %328 }
  0x9c   : > { %1391 = vperm.xlu1 %2591, %v1345_v17   ;;  %1386 = vperm.xlu0 %2590, %v1344_v18  }
  0x9f   : > { %v3243_v23 = vpop.permute.xlu1 %343  ;;  %v3245_v24 = vpop.permute.xlu0 %338 }
  0xa0   : > { %1401 = vperm.xlu1 %2591, %v1347_v21   ;;  %1396 = vperm.xlu0 %2590, %v1346_v22   ;;  %v2201_v21 = vld [vmem:[%s3860_s3 + $0x188] sm:$0xff]  ;;  %v2200_v22 = vld [vmem:[%s3860_s3 + $0x180] sm:$0xff] }
  0xa3   : > { %v3253_v27 = vpop.permute.xlu1 %353  ;;  %v3255_v28 = vpop.permute.xlu0 %348 }
  0xa4   : > { %1411 = vperm.xlu1 %2591, %v1349_v25   ;;  %1406 = vperm.xlu0 %2590, %v1348_v26  }
  0xa7   : > { %v3263_v31 = vpop.permute.xlu1 %363  ;;  %v3265_v32 = vpop.permute.xlu0 %358 }
  0xa8   : > { %3873 = vst [vmem:[#allocation3_spill] sm:$0xff] %v3263_v31  ;;  %1421 = vperm.xlu1 %2591, %v1351_v29   ;;  %1416 = vperm.xlu0 %2590, %v1350_v30   ;;  %v2202_v29 = vld [vmem:[%s3860_s3 + $0x190] sm:$0xff]  ;;  %v1867_v30 = vld [vmem:[%s3859_s2 + $0x1a0] sm:$0xff] }
  0xab   : > { %v3273_v35 = vpop.permute.xlu1 %373  ;;  %v3275_v36 = vpop.permute.xlu0 %368 }
  0xac   : > { %3874 = vst [vmem:[#allocation4_spill] sm:$0xff] %v3273_v35  ;;  %3875 = vst [vmem:[#allocation5_spill] sm:$0xff] %v3275_v36  ;;  %1431 = vperm.xlu1 %2591, %v1353_v33   ;;  %1426 = vperm.xlu0 %2590, %v1352_v34  }
  0xaf   : > { %v3283_v39 = vpop.permute.xlu1 %648  ;;  %v3285_v40 = vpop.permute.xlu0 %643 }
  0xb0   : > { %1698 = vperm.xlu1 %2591, %v1676_v37   ;;  %1693 = vperm.xlu0 %2590, %v1675_v38   ;;  %v2203_v37 = vld [vmem:[%s3860_s3 + $0x198] sm:$0xff]  ;;  %v1868_v38 = vld [vmem:[%s3859_s2 + $0x1a8] sm:$0xff] }
  0xb3   : > { %v3293_v43 = vpop.permute.xlu1 %658  ;;  %v3295_v44 = vpop.permute.xlu0 %653 }
  0xb4   : > { %1708 = vperm.xlu1 %2591, %v1678_v41   ;;  %1703 = vperm.xlu0 %2590, %v1677_v42  }
  0xb7   : > { %v3303_v47 = vpop.permute.xlu1 %668  ;;  %v3305_v48 = vpop.permute.xlu0 %663 }
  0xb8   : > { %1718 = vperm.xlu1 %2591, %v1680_v45   ;;  %1713 = vperm.xlu0 %2590, %v1679_v46   ;;  %v2204_v45 = vld [vmem:[%s3860_s3 + $0x1a0] sm:$0xff]  ;;  %v1869_v46 = vld [vmem:[%s3859_s2 + $0x1b0] sm:$0xff] }
  0xbb   : > { %v3313_v51 = vpop.permute.xlu1 %678  ;;  %v3315_v52 = vpop.permute.xlu0 %673 }
  0xbc   : > { %1728 = vperm.xlu1 %2591, %v1682_v49   ;;  %1723 = vperm.xlu0 %2590, %v1681_v50  }
  0xbf   : > { %v3323_v55 = vpop.permute.xlu1 %688  ;;  %v3325_v56 = vpop.permute.xlu0 %683 }
  0xc0   : > { %1738 = vperm.xlu1 %2591, %v1684_v53   ;;  %1733 = vperm.xlu0 %2590, %v1683_v54   ;;  %v2205_v53 = vld [vmem:[%s3860_s3 + $0x1a8] sm:$0xff]  ;;  %v1870_v54 = vld [vmem:[%s3859_s2 + $0x1b8] sm:$0xff] }
  0xc3   : > { %v3333_v59 = vpop.permute.xlu1 %698  ;;  %v3335_v60 = vpop.permute.xlu0 %693 }
  0xc4   : > { %1748 = vperm.xlu1 %2591, %v1686_v57   ;;  %1743 = vperm.xlu0 %2590, %v1685_v58  }
  0xc7   : > { %v3343_v63 = vpop.permute.xlu1 %708  ;;  %v3345_v0 = vpop.permute.xlu0 %703 }
  0xc8   : > { %3876 = vst [vmem:[#allocation6_spill] sm:$0xff] %v3343_v63  ;;  %3877 = vst [vmem:[#allocation7_spill] sm:$0xff] %v3345_v0  ;;  %1758 = vperm.xlu1 %2591, %v1688_v61   ;;  %1753 = vperm.xlu0 %2590, %v1687_v62   ;;  %v2206_v61 = vld [vmem:[%s3860_s3 + $0x1b0] sm:$0xff]  ;;  %v1871_v62 = vld [vmem:[%s3859_s2 + $0x1c0] sm:$0xff] }
  0xcb   : > { %v3353_v6 = vpop.permute.xlu1 %718  ;;  %v3355_v7 = vpop.permute.xlu0 %713 }
  0xcc   : > { %3878 = vst [vmem:[#allocation8_spill] sm:$0xff] %v3353_v6  ;;  %3879 = vst [vmem:[#allocation9_spill] sm:$0xff] %v3355_v7  ;;  %1768 = vperm.xlu1 %2591, %v1690_v1   ;;  %1763 = vperm.xlu0 %2590, %v1689_v2  }
  0xcf   : > { %v3363_v12 = vpop.permute.xlu1 %836  ;;  %v832_v13 = vpop.permute.xlu0 %831 }
  0xd0   : > { %1886 = vperm.xlu1 %2591, %v1864_v8   ;;  %1881 = vperm.xlu0 %2590, %v1863_v9  }
  0xd3   : > { %v3371_v17 = vpop.permute.xlu1 %846  ;;  %v3373_v18 = vpop.permute.xlu0 %841 }
  0xd4   : > { %1896 = vperm.xlu1 %2591, %v1866_v14   ;;  %1891 = vperm.xlu0 %2590, %v1865_v15   ;;  %v2207_v14 = vld [vmem:[%s3860_s3 + $0x1b8] sm:$0xff]  ;;  %v1872_v15 = vld [vmem:[%s3859_s2 + $0x1c8] sm:$0xff] }
  0xd7   : > { %v3381_v25 = vpop.permute.xlu1 %856  ;;  %v3383_v26 = vpop.permute.xlu0 %851 }
  0xd8   : > { %2223 = vperm.xlu1 %2591, %v2201_v21   ;;  %2218 = vperm.xlu0 %2590, %v2200_v22  }
  0xdb   : > { %v3391_v33 = vpop.permute.xlu1 %866  ;;  %v3393_v34 = vpop.permute.xlu0 %861 }
  0xdc   : > { %2228 = vperm.xlu1 %2591, %v2202_v29   ;;  %1901 = vperm.xlu0 %2590, %v1867_v30  }
  0xdf   : > { %v3401_v41 = vpop.permute.xlu1 %876  ;;  %v3403_v42 = vpop.permute.xlu0 %871 }
  0xe0   : > { %2233 = vperm.xlu1 %2591, %v2203_v37   ;;  %1906 = vperm.xlu0 %2590, %v1868_v38  }
  0xe3   : > { %v3411_v49 = vpop.permute.xlu1 %886  ;;  %v3413_v50 = vpop.permute.xlu0 %881 }
  0xe4   : > { %2238 = vperm.xlu1 %2591, %v2204_v45   ;;  %1911 = vperm.xlu0 %2590, %v1869_v46  }
  0xe7   : > { %v3421_v57 = vpop.permute.xlu1 %896  ;;  %v3423_v58 = vpop.permute.xlu0 %891 }
  0xe8   : > { %3880 = vst [vmem:[#allocation10_spill] sm:$0xff] %v3421_v57  ;;  %2243 = vperm.xlu1 %2591, %v2205_v53   ;;  %1916 = vperm.xlu0 %2590, %v1870_v54   ;;  %v2208_v54 = vld [vmem:[%s3860_s3 + $0x1c0] sm:$0xff] }
  0xeb   : > { %v3431_v1 = vpop.permute.xlu1 %906  ;;  %v3433_v2 = vpop.permute.xlu0 %901 }
  0xec   : > { %3881 = vst [vmem:[#allocation11_spill] sm:$0xff] %v3431_v1  ;;  %3882 = vst [vmem:[#allocation12_spill] sm:$0xff] %v3433_v2  ;;  %2248 = vperm.xlu1 %2591, %v2206_v61   ;;  %1921 = vperm.xlu0 %2590, %v1871_v62   ;;  %v498_v8 = vpop.f32.mrb[0].mxu0  ;;  %v1023_v9 = vpop.f32.mrb[0].mxu1 }
  0xed   : > { %v499_v21 = vadd.f32 %v498_v8, %v3185_v4  ;;  %v1024_v22 = vadd.f32 %v1023_v9, %v832_v13  ;;  %v500_v29 = vpop.f32.mrb[1].mxu0  ;;  %v1025_v30 = vpop.f32.mrb[1].mxu1  ;;  %v1873_v9 = vld [vmem:[%s3859_s2 + $0x1d0] sm:$0xff] }
  0xee   : > { %v501_v37 = vadd.f32 %v500_v29, %v3185_v4  ;;  %v1026_v38 = vadd.f32 %v1025_v30, %v832_v13 }
  0xef   : > { %v1174_v45 = vpop.permute.xlu1 %1173  ;;  %v1169_v46 = vpop.permute.xlu0 %1168  ;;  %v1118_v53 = vmax.f32 %v1024_v22, 0.0  ;;  %v593_v61 = vmax.f32 %v499_v21, 0.0 }
  0xf0   : > { %2253 = vperm.xlu1 %2591, %v2207_v14   ;;  %1926 = vperm.xlu0 %2590, %v1872_v15   ;;  %v594_v62 = vmax.f32 %v501_v37, 0.0  ;;  %v1119_v6 = vmax.f32 %v1026_v38, 0.0  ;;  %v504_v1 = vpop.f32.mrb[2].mxu0  ;;  %v1029_v8 = vpop.f32.mrb[2].mxu1 }
  0xf1   : > { %v1246_v4 = vmul.f32 %v1169_v46, %v1118_v53  ;;  %v505_v13 = vadd.f32 %v504_v1, %v3205_v11  ;;  %v1030_v22 = vadd.f32 %v1029_v8, %v3363_v12  ;;  %v506_v14 = vpop.f32.mrb[3].mxu0  ;;  %v1031_v15 = vpop.f32.mrb[3].mxu1  ;;  %v721_v53 = vmul.f32 %v3285_v40, %v593_v61 }
  0xf2   : > { %v1247_v29 = vmul.f32 %v1169_v46, %v1119_v6  ;;  %v507_v30 = vadd.f32 %v506_v14, %v3205_v11  ;;  %v1032_v21 = vadd.f32 %v1031_v15, %v3363_v12  ;;  %v722_v1 = vmul.f32 %v3285_v40, %v594_v62  ;;  %v2209_v11 = vld [vmem:[%s3860_s3 + $0x1c8] sm:$0xff]  ;;  %v1874_v6 = vld [vmem:[%s3859_s2 + $0x1d8] sm:$0xff] }
  0xf3   : > { %v3453_v37 = vpop.permute.xlu1 %1183  ;;  %v1179_v38 = vpop.permute.xlu0 %1178  ;;  %v595_v35 = vmax.f32 %v505_v13, 0.0  ;;  %v1120_v7 = vmax.f32 %v1030_v22, 0.0 }
  0xf4   : > { %2258 = vperm.xlu1 %2591, %v2208_v54   ;;  %1931 = vperm.xlu0 %2590, %v1873_v9   ;;  %v596_v2 = vmax.f32 %v507_v30, 0.0  ;;  %v1121_v8 = vmax.f32 %v1032_v21, 0.0  ;;  %v510_v36 = vpop.f32.mrb[4].mxu0  ;;  %v1035_v63 = vpop.f32.mrb[4].mxu1 }
  0xf5   : > { %v723_v12 = vmul.f32 %v3283_v39, %v595_v35  ;;  %v1248_v46 = vmul.f32 %v1174_v45, %v1120_v7  ;;  %v511_v54 = vadd.f32 %v510_v36, %v3183_v3  ;;  %v1036_v61 = vadd.f32 %v1035_v63, %v3373_v18  ;;  %v512_v40 = vpop.f32.mrb[5].mxu0  ;;  %v1037_v62 = vpop.f32.mrb[5].mxu1 }
  0xf6   : > { %v724_v9 = vmul.f32 %v3283_v39, %v596_v2  ;;  %v1249_v13 = vmul.f32 %v1174_v45, %v1121_v8  ;;  %v513_v22 = vadd.f32 %v512_v40, %v3183_v3  ;;  %v1038_v14 = vadd.f32 %v1037_v62, %v3373_v18  ;;  %v2210_v3 = vld [vmem:[%s3860_s3 + $0x1d0] sm:$0xff]  ;;  %v1875_v18 = vld [vmem:[%s3859_s2 + $0x1e0] sm:$0xff] }
  0xf7   : > { %v3469_v15 = vpop.permute.xlu1 %1193  ;;  %v3471_v30 = vpop.permute.xlu0 %1188  ;;  %v753_v21 = vadd.f32 %v723_v12, %v721_v53  ;;  %v1278_v35 = vadd.f32 %v1248_v46, %v1246_v4  ;;  %v597_v7 = vmax.f32 %v511_v54, 0.0  ;;  %v1122_v57 = vmax.f32 %v1036_v61, 0.0 }
  0xf8   : > { %2263 = vperm.xlu1 %2591, %v2209_v11   ;;  %1936 = vperm.xlu0 %2590, %v1874_v6   ;;  %v774_v36 = vadd.f32 %v724_v9, %v722_v1  ;;  %v1299_v63 = vadd.f32 %v1249_v13, %v1247_v29  ;;  %v598_v31 = vmax.f32 %v513_v22, 0.0  ;;  %v1123_v0 = vmax.f32 %v1038_v14, 0.0  ;;  %v516_v39 = vpop.f32.mrb[6].mxu0  ;;  %v1041_v2 = vpop.f32.mrb[6].mxu1 }
  0xf9   : > { %v725_v45 = vmul.f32 %v3295_v44, %v597_v7  ;;  %v1250_v4 = vmul.f32 %v1179_v38, %v1122_v57  ;;  %v517_v53 = vadd.f32 %v516_v39, %v3203_v10  ;;  %v1042_v1 = vadd.f32 %v1041_v2, %v3371_v17  ;;  %v518_v29 = vpop.f32.mrb[7].mxu0  ;;  %v1043_v8 = vpop.f32.mrb[7].mxu1 }
  0xfa   : > { %v726_v11 = vmul.f32 %v3295_v44, %v598_v31  ;;  %v1251_v6 = vmul.f32 %v1179_v38, %v1123_v0  ;;  %v519_v12 = vadd.f32 %v518_v29, %v3203_v10  ;;  %v1044_v46 = vadd.f32 %v1043_v8, %v3371_v17  ;;  %v2211_v10 = vld [vmem:[%s3860_s3 + $0x1d8] sm:$0xff]  ;;  %v1876_v0 = vld [vmem:[%s3859_s2 + $0x1e8] sm:$0xff] }
  0xfb   : > { %v3485_v54 = vpop.permute.xlu1 %1203  ;;  %v3487_v61 = vpop.permute.xlu0 %1198  ;;  %v754_v40 = vadd.f32 %v753_v21, %v725_v45  ;;  %v1279_v62 = vadd.f32 %v1278_v35, %v1250_v4  ;;  %v599_v57 = vmax.f32 %v517_v53, 0.0  ;;  %v1124_v9 = vmax.f32 %v1042_v1, 0.0 }
  0xfc   : > { %2268 = vperm.xlu1 %2591, %v2210_v3   ;;  %1941 = vperm.xlu0 %2590, %v1875_v18   ;;  %v775_v13 = vadd.f32 %v774_v36, %v726_v11  ;;  %v1300_v22 = vadd.f32 %v1299_v63, %v1251_v6  ;;  %v600_v14 = vmax.f32 %v519_v12, 0.0  ;;  %v1125_v7 = vmax.f32 %v1044_v46, 0.0  ;;  %v522_v31 = vpop.f32.mrb[8].mxu0  ;;  %v1047_v44 = vpop.f32.mrb[8].mxu1 }
  0xfd   : > { %v727_v17 = vmul.f32 %v3293_v43, %v599_v57  ;;  %v1252_v38 = vmul.f32 %v3453_v37, %v1124_v9  ;;  %v523_v21 = vadd.f32 %v522_v31, %v3225_v5  ;;  %v1048_v35 = vadd.f32 %v1047_v44, %v3383_v26  ;;  %v524_v36 = vpop.f32.mrb[9].mxu0  ;;  %v1049_v63 = vpop.f32.mrb[9].mxu1 }
  0xfe   : > { %v728_v39 = vmul.f32 %v3293_v43, %v600_v14  ;;  %v1253_v2 = vmul.f32 %v3453_v37, %v1125_v7  ;;  %v525_v3 = vadd.f32 %v524_v36, %v3225_v5  ;;  %v1050_v18 = vadd.f32 %v1049_v63, %v3383_v26  ;;  %v2212_v5 = vld [vmem:[%s3860_s3 + $0x1e0] sm:$0xff]  ;;  %v1877_v26 = vld [vmem:[%s3859_s2 + $0x1f0] sm:$0xff] }
  0xff   : > { %v3503_v45 = vpop.permute.xlu1 %1213  ;;  %v3505_v4 = vpop.permute.xlu0 %1208  ;;  %v755_v53 = vadd.f32 %v754_v40, %v727_v17  ;;  %v1280_v1 = vadd.f32 %v1279_v62, %v1252_v38  ;;  %v601_v29 = vmax.f32 %v523_v21, 0.0  ;;  %v1126_v8 = vmax.f32 %v1048_v35, 0.0 }
 0x100   : > { %2273 = vperm.xlu1 %2591, %v2211_v10   ;;  %1946 = vperm.xlu0 %2590, %v1876_v0   ;;  %v776_v11 = vadd.f32 %v775_v13, %v728_v39  ;;  %v1301_v6 = vadd.f32 %v1300_v22, %v1253_v2  ;;  %v602_v12 = vmax.f32 %v525_v3, 0.0  ;;  %v1127_v43 = vmax.f32 %v1050_v18, 0.0  ;;  %v528_v46 = vpop.f32.mrb[10].mxu0  ;;  %v1053_v37 = vpop.f32.mrb[10].mxu1 }
 0x101   : > { %v729_v40 = vmul.f32 %v3305_v48, %v601_v29  ;;  %v1254_v62 = vmul.f32 %v3471_v30, %v1126_v8  ;;  %v529_v57 = vadd.f32 %v528_v46, %v3223_v16  ;;  %v1054_v9 = vadd.f32 %v1053_v37, %v3381_v25  ;;  %v530_v13 = vpop.f32.mrb[11].mxu0  ;;  %v1055_v22 = vpop.f32.mrb[11].mxu1 }
 0x102   : > { %v730_v14 = vmul.f32 %v3305_v48, %v602_v12  ;;  %v1255_v7 = vmul.f32 %v3471_v30, %v1127_v43  ;;  %v531_v31 = vadd.f32 %v530_v13, %v3223_v16  ;;  %v1056_v44 = vadd.f32 %v1055_v22, %v3381_v25  ;;  %v2213_v16 = vld [vmem:[%s3860_s3 + $0x1e8] sm:$0xff]  ;;  %v1878_v25 = vld [vmem:[%s3859_s2 + $0x1f8] sm:$0xff] }
 0x103   : > { %v3521_v10 = vpop.permute.xlu1 %1223  ;;  %v3523_v0 = vpop.permute.xlu0 %1218  ;;  %v756_v17 = vadd.f32 %v755_v53, %v729_v40  ;;  %v1281_v38 = vadd.f32 %v1280_v1, %v1254_v62  ;;  %v603_v21 = vmax.f32 %v529_v57, 0.0  ;;  %v1128_v35 = vmax.f32 %v1054_v9, 0.0 }
 0x104   : > { %2278 = vperm.xlu1 %2591, %v2212_v5   ;;  %1951 = vperm.xlu0 %2590, %v1877_v26   ;;  %v777_v36 = vadd.f32 %v776_v11, %v730_v14  ;;  %v1302_v63 = vadd.f32 %v1301_v6, %v1255_v7  ;;  %v604_v39 = vmax.f32 %v531_v31, 0.0  ;;  %v1129_v48 = vmax.f32 %v1056_v44, 0.0  ;;  %v534_v2 = vpop.f32.mrb[12].mxu0  ;;  %v1059_v30 = vpop.f32.mrb[12].mxu1 }
 0x105   : > { %v731_v3 = vmul.f32 %v3303_v47, %v603_v21  ;;  %v1256_v18 = vmul.f32 %v3469_v15, %v1128_v35  ;;  %v535_v53 = vadd.f32 %v534_v2, %v3235_v20  ;;  %v1060_v1 = vadd.f32 %v1059_v30, %v3393_v34  ;;  %v536_v29 = vpop.f32.mrb[13].mxu0  ;;  %v1061_v8 = vpop.f32.mrb[13].mxu1 }
 0x106   : > { %v732_v11 = vmul.f32 %v3303_v47, %v604_v39  ;;  %v1257_v6 = vmul.f32 %v3469_v15, %v1129_v48  ;;  %v537_v12 = vadd.f32 %v536_v29, %v3235_v20  ;;  %v1062_v43 = vadd.f32 %v1061_v8, %v3393_v34  ;;  %v2215_v20 = vld [vmem:[%s3860_s3 + $0x1f8] sm:$0xff]  ;;  %v2214_v34 = vld [vmem:[%s3860_s3 + $0x1f0] sm:$0xff] }
 0x107   : > { %v3539_v46 = vpop.permute.xlu1 %1233  ;;  %v3541_v37 = vpop.permute.xlu0 %1228  ;;  %v757_v5 = vadd.f32 %v756_v17, %v731_v3  ;;  %v1282_v26 = vadd.f32 %v1281_v38, %v1256_v18  ;;  %v605_v40 = vmax.f32 %v535_v53, 0.0  ;;  %v1130_v62 = vmax.f32 %v1060_v1, 0.0 }
 0x108   : > { %2283 = vperm.xlu1 %2591, %v2213_v16   ;;  %1956 = vperm.xlu0 %2590, %v1878_v25   ;;  %v778_v57 = vadd.f32 %v777_v36, %v732_v11  ;;  %v1303_v9 = vadd.f32 %v1302_v63, %v1257_v6  ;;  %v606_v13 = vmax.f32 %v537_v12, 0.0  ;;  %v1131_v47 = vmax.f32 %v1062_v43, 0.0  ;;  %v540_v22 = vpop.f32.mrb[14].mxu0  ;;  %v1065_v15 = vpop.f32.mrb[14].mxu1 }
 0x109   : > { %v733_v14 = vmul.f32 %v3315_v52, %v605_v40  ;;  %v1258_v7 = vmul.f32 %v3487_v61, %v1130_v62  ;;  %v541_v31 = vadd.f32 %v540_v22, %v3233_v19  ;;  %v1066_v44 = vadd.f32 %v1065_v15, %v3391_v33  ;;  %v542_v17 = vpop.f32.mrb[15].mxu0  ;;  %v1067_v38 = vpop.f32.mrb[15].mxu1 }
 0x10a   : > { %v734_v21 = vmul.f32 %v3315_v52, %v606_v13  ;;  %v1259_v35 = vmul.f32 %v3487_v61, %v1131_v47  ;;  %v543_v36 = vadd.f32 %v542_v17, %v3233_v19  ;;  %v1068_v63 = vadd.f32 %v1067_v38, %v3391_v33 }
 0x10b   : > { %v3557_v39 = vpop.permute.xlu1 %1243  ;;  %v3559_v48 = vpop.permute.xlu0 %1238  ;;  %v758_v2 = vadd.f32 %v757_v5, %v733_v14  ;;  %v1283_v30 = vadd.f32 %v1282_v26, %v1258_v7  ;;  %v607_v16 = vmax.f32 %v541_v31, 0.0  ;;  %v1132_v25 = vmax.f32 %v1066_v44, 0.0 }
 0x10c   : > { %2293 = vperm.xlu1 %2591, %v2215_v20   ;;  %2288 = vperm.xlu0 %2590, %v2214_v34   ;;  %v779_v3 = vadd.f32 %v778_v57, %v734_v21  ;;  %v1304_v18 = vadd.f32 %v1303_v9, %v1259_v35  ;;  %v608_v53 = vmax.f32 %v543_v36, 0.0  ;;  %v1133_v52 = vmax.f32 %v1068_v63, 0.0  ;;  %v546_v1 = vpop.f32.mrb[16].mxu0  ;;  %v1071_v61 = vpop.f32.mrb[16].mxu1 }
 0x10d   : > { %v735_v19 = vmul.f32 %v3313_v51, %v607_v16  ;;  %v1260_v33 = vmul.f32 %v3485_v54, %v1132_v25  ;;  %v547_v29 = vadd.f32 %v546_v1, %v3245_v24  ;;  %v1072_v8 = vadd.f32 %v1071_v61, %v3403_v42  ;;  %v548_v11 = vpop.f32.mrb[17].mxu0  ;;  %v1073_v6 = vpop.f32.mrb[17].mxu1 }
 0x10e   : > { %v736_v12 = vmul.f32 %v3313_v51, %v608_v53  ;;  %v1261_v43 = vmul.f32 %v3485_v54, %v1133_v52  ;;  %v549_v5 = vadd.f32 %v548_v11, %v3245_v24  ;;  %v1074_v26 = vadd.f32 %v1073_v6, %v3403_v42 }
 0x10f   : > { %v3569_v40 = vpop.permute.xlu1 %1361  ;;  %v3571_v62 = vpop.permute.xlu0 %1356  ;;  %v759_v57 = vadd.f32 %v758_v2, %v735_v19  ;;  %v1284_v9 = vadd.f32 %v1283_v30, %v1260_v33  ;;  %v609_v13 = vmax.f32 %v547_v29, 0.0  ;;  %v1134_v47 = vmax.f32 %v1072_v8, 0.0 }
 0x110   : > { %v780_v22 = vadd.f32 %v779_v3, %v736_v12  ;;  %v1305_v15 = vadd.f32 %v1304_v18, %v1261_v43  ;;  %v610_v20 = vmax.f32 %v549_v5, 0.0  ;;  %v1135_v34 = vmax.f32 %v1074_v26, 0.0  ;;  %v552_v14 = vpop.f32.mrb[18].mxu0  ;;  %v1077_v51 = vpop.f32.mrb[18].mxu1 }
 0x111   : > { %v737_v54 = vmul.f32 %v3325_v56, %v609_v13  ;;  %v1262_v24 = vmul.f32 %v3505_v4, %v1134_v47  ;;  %v553_v42 = vadd.f32 %v552_v14, %v3243_v23  ;;  %v1078_v7 = vadd.f32 %v1077_v51, %v3401_v41  ;;  %v554_v31 = vpop.f32.mrb[19].mxu0  ;;  %v1079_v44 = vpop.f32.mrb[19].mxu1 }
 0x112   : > { %v738_v17 = vmul.f32 %v3325_v56, %v610_v20  ;;  %v1263_v38 = vmul.f32 %v3505_v4, %v1135_v34  ;;  %v555_v21 = vadd.f32 %v554_v31, %v3243_v23  ;;  %v1080_v35 = vadd.f32 %v1079_v44, %v3401_v41 }
 0x113   : > { %v3581_v36 = vpop.permute.xlu1 %1371  ;;  %v3583_v63 = vpop.permute.xlu0 %1366  ;;  %v760_v2 = vadd.f32 %v759_v57, %v737_v54  ;;  %v1285_v30 = vadd.f32 %v1284_v9, %v1262_v24  ;;  %v611_v16 = vmax.f32 %v553_v42, 0.0  ;;  %v1136_v25 = vmax.f32 %v1078_v7, 0.0 }
 0x114   : > { %v781_v3 = vadd.f32 %v780_v22, %v738_v17  ;;  %v1306_v18 = vadd.f32 %v1305_v15, %v1263_v38  ;;  %v612_v53 = vmax.f32 %v555_v21, 0.0  ;;  %v1137_v52 = vmax.f32 %v1080_v35, 0.0  ;;  %v558_v1 = vpop.f32.mrb[20].mxu0  ;;  %v1083_v56 = vpop.f32.mrb[20].mxu1 }
 0x115   : > { %v739_v4 = vmul.f32 %v3323_v55, %v611_v16  ;;  %v1264_v23 = vmul.f32 %v3503_v45, %v1136_v25  ;;  %v559_v41 = vadd.f32 %v558_v1, %v3255_v28  ;;  %v1084_v61 = vadd.f32 %v1083_v56, %v3413_v50  ;;  %v560_v19 = vpop.f32.mrb[21].mxu0  ;;  %v1085_v33 = vpop.f32.mrb[21].mxu1 }
 0x116   : > { %v740_v29 = vmul.f32 %v3323_v55, %v612_v53  ;;  %v1265_v8 = vmul.f32 %v3503_v45, %v1137_v52  ;;  %v561_v11 = vadd.f32 %v560_v19, %v3255_v28  ;;  %v1086_v6 = vadd.f32 %v1085_v33, %v3413_v50 }
 0x117   : > { %v3593_v12 = vpop.permute.xlu1 %1381  ;;  %v3595_v43 = vpop.permute.xlu0 %1376  ;;  %v761_v5 = vadd.f32 %v760_v2, %v739_v4  ;;  %v1286_v26 = vadd.f32 %v1285_v30, %v1264_v23  ;;  %v613_v57 = vmax.f32 %v559_v41, 0.0  ;;  %v1138_v9 = vmax.f32 %v1084_v61, 0.0 }
 0x118   : > { %v782_v13 = vadd.f32 %v781_v3, %v740_v29  ;;  %v1307_v47 = vadd.f32 %v1306_v18, %v1265_v8  ;;  %v614_v22 = vmax.f32 %v561_v11, 0.0  ;;  %v1139_v15 = vmax.f32 %v1086_v6, 0.0  ;;  %v564_v20 = vpop.f32.mrb[22].mxu0  ;;  %v1089_v55 = vpop.f32.mrb[22].mxu1 }
 0x119   : > { %v741_v45 = vmul.f32 %v3335_v60, %v613_v57  ;;  %v1266_v28 = vmul.f32 %v3523_v0, %v1138_v9  ;;  %v565_v50 = vadd.f32 %v564_v20, %v3253_v27  ;;  %v1090_v34 = vadd.f32 %v1089_v55, %v3411_v49  ;;  %v566_v14 = vpop.f32.mrb[23].mxu0  ;;  %v1091_v51 = vpop.f32.mrb[23].mxu1  ;;  %v3883_v9 = vld [vmem:[#allocation7_spill] sm:$0xff] }
 0x11a   : > { %v742_v54 = vmul.f32 %v3335_v60, %v614_v22  ;;  %v1267_v24 = vmul.f32 %v3523_v0, %v1139_v15  ;;  %v567_v42 = vadd.f32 %v566_v14, %v3253_v27  ;;  %v1092_v7 = vadd.f32 %v1091_v51, %v3411_v49 }
 0x11b   : > { %v3605_v31 = vpop.permute.xlu1 %1391  ;;  %v3607_v44 = vpop.permute.xlu0 %1386  ;;  %v762_v17 = vadd.f32 %v761_v5, %v741_v45  ;;  %v1287_v38 = vadd.f32 %v1286_v26, %v1266_v28  ;;  %v615_v21 = vmax.f32 %v565_v50, 0.0  ;;  %v1140_v35 = vmax.f32 %v1090_v34, 0.0 }
 0x11c   : > { %v783_v2 = vadd.f32 %v782_v13, %v742_v54  ;;  %v1308_v30 = vadd.f32 %v1307_v47, %v1267_v24  ;;  %v616_v16 = vmax.f32 %v567_v42, 0.0  ;;  %v1141_v25 = vmax.f32 %v1092_v7, 0.0  ;;  %v570_v3 = vpop.f32.mrb[24].mxu0  ;;  %v1095_v60 = vpop.f32.mrb[24].mxu1  ;;  %v3884_v13 = vld [vmem:[#allocation3_spill] sm:$0xff]  ;;  %v3885_v47 = vld [vmem:[#allocation10_spill] sm:$0xff] }
 0x11d   : > { %v743_v0 = vmul.f32 %v3333_v59, %v615_v21  ;;  %v1268_v27 = vmul.f32 %v3521_v10, %v1140_v35  ;;  %v571_v49 = vadd.f32 %v570_v3, %v3265_v32  ;;  %v1096_v18 = vadd.f32 %v1095_v60, %v3423_v58  ;;  %v572_v53 = vpop.f32.mrb[25].mxu0  ;;  %v1097_v52 = vpop.f32.mrb[25].mxu1  ;;  %v3888_v60 = vld [vmem:[#allocation12_spill] sm:$0xff] }
 0x11e   : > { %v744_v1 = vmul.f32 %v3333_v59, %v616_v16  ;;  %v1269_v56 = vmul.f32 %v3521_v10, %v1141_v25  ;;  %v573_v4 = vadd.f32 %v572_v53, %v3265_v32  ;;  %v1098_v23 = vadd.f32 %v1097_v52, %v3423_v58  ;;  %v3887_v25 = vld [vmem:[#allocation5_spill] sm:$0xff] }
 0x11f   : > { %v3617_v41 = vpop.permute.xlu1 %1401  ;;  %v3619_v61 = vpop.permute.xlu0 %1396  ;;  %v763_v19 = vadd.f32 %v762_v17, %v743_v0  ;;  %v1288_v33 = vadd.f32 %v1287_v38, %v1268_v27  ;;  %v617_v29 = vmax.f32 %v571_v49, 0.0  ;;  %v1142_v8 = vmax.f32 %v1096_v18, 0.0 }
 0x120   : > { %v784_v11 = vadd.f32 %v783_v2, %v744_v1  ;;  %v1309_v6 = vadd.f32 %v1308_v30, %v1269_v56  ;;  %v618_v5 = vmax.f32 %v573_v4, 0.0  ;;  %v1143_v26 = vmax.f32 %v1098_v23, 0.0  ;;  %v576_v57 = vpop.f32.mrb[26].mxu0  ;;  %v1101_v59 = vpop.f32.mrb[26].mxu1  ;;  %v3886_v30 = vld [vmem:[#allocation6_spill] sm:$0xff] }
 0x121   : > { %v745_v10 = vmul.f32 %v3883_v9, %v617_v29  ;;  %v1270_v32 = vmul.f32 %v3541_v37, %v1142_v8  ;;  %v577_v58 = vadd.f32 %v576_v57, %v3884_v13  ;;  %v1102_v22 = vadd.f32 %v1101_v59, %v3885_v47  ;;  %v578_v15 = vpop.f32.mrb[27].mxu0  ;;  %v1103_v20 = vpop.f32.mrb[27].mxu1  ;;  %v3889_v59 = vld [vmem:[#allocation9_spill] sm:$0xff] }
 0x122   : > { %v746_v55 = vmul.f32 %v3883_v9, %v618_v5  ;;  %v1271_v45 = vmul.f32 %v3541_v37, %v1143_v26  ;;  %v579_v28 = vadd.f32 %v578_v15, %v3884_v13  ;;  %v1104_v50 = vadd.f32 %v1103_v20, %v3885_v47  ;;  %v3891_v13 = vld [vmem:[#allocation11_spill] sm:$0xff] }
 0x123   : > { %v3629_v34 = vpop.permute.xlu1 %1411  ;;  %v3631_v14 = vpop.permute.xlu0 %1406  ;;  %v764_v51 = vadd.f32 %v763_v19, %v745_v10  ;;  %v1289_v54 = vadd.f32 %v1288_v33, %v1270_v32  ;;  %v619_v24 = vmax.f32 %v577_v58, 0.0  ;;  %v1144_v42 = vmax.f32 %v1102_v22, 0.0  ;;  %v3890_v10 = vld [vmem:[#allocation4_spill] sm:$0xff] }
 0x124   : > { %v785_v7 = vadd.f32 %v784_v11, %v746_v55  ;;  %v1310_v17 = vadd.f32 %v1309_v6, %v1271_v45  ;;  %v620_v38 = vmax.f32 %v579_v28, 0.0  ;;  %v1145_v21 = vmax.f32 %v1104_v50, 0.0  ;;  %v582_v35 = vpop.f32.mrb[28].mxu0  ;;  %v1107_v2 = vpop.f32.mrb[28].mxu1 }
 0x125   : > { %v747_v37 = vmul.f32 %v3886_v30, %v619_v24  ;;  %v1272_v16 = vmul.f32 %v3539_v46, %v1144_v42  ;;  %v583_v3 = vadd.f32 %v582_v35, %v3887_v25  ;;  %v1108_v0 = vadd.f32 %v1107_v2, %v3888_v60  ;;  %v584_v27 = vpop.f32.mrb[29].mxu0  ;;  %v1109_v49 = vpop.f32.mrb[29].mxu1 }
 0x126   : > { %v748_v18 = vmul.f32 %v3886_v30, %v620_v38  ;;  %v1273_v53 = vmul.f32 %v3539_v46, %v1145_v21  ;;  %v585_v52 = vadd.f32 %v584_v27, %v3887_v25  ;;  %v1110_v1 = vadd.f32 %v1109_v49, %v3888_v60 }
 0x127   : > { %v3641_v56 = vpop.permute.xlu1 %1421  ;;  %v3643_v4 = vpop.permute.xlu0 %1416  ;;  %v765_v23 = vadd.f32 %v764_v51, %v747_v37  ;;  %v1290_v19 = vadd.f32 %v1289_v54, %v1272_v16  ;;  %v621_v33 = vmax.f32 %v583_v3, 0.0  ;;  %v1146_v29 = vmax.f32 %v1108_v0, 0.0 }
 0x128   : > { %v786_v8 = vadd.f32 %v785_v7, %v748_v18  ;;  %v1311_v11 = vadd.f32 %v1310_v17, %v1273_v53  ;;  %v622_v6 = vmax.f32 %v585_v52, 0.0  ;;  %v1147_v5 = vmax.f32 %v1110_v1, 0.0  ;;  %v588_v26 = vpop.f32.mrb[30].mxu0  ;;  %v1113_v57 = vpop.f32.mrb[30].mxu1 }
 0x129   : > { %v749_v46 = vmul.f32 %v3889_v59, %v621_v33  ;;  %v1274_v9 = vmul.f32 %v3559_v48, %v1146_v29  ;;  %v589_v32 = vadd.f32 %v588_v26, %v3890_v10  ;;  %v1114_v58 = vadd.f32 %v1113_v57, %v3891_v13  ;;  %v590_v47 = vpop.f32.mrb[31].mxu0  ;;  %v1115_v22 = vpop.f32.mrb[31].mxu1 }
 0x12a   : > { %v750_v15 = vmul.f32 %v3889_v59, %v622_v6  ;;  %v1275_v20 = vmul.f32 %v3559_v48, %v1147_v5  ;;  %v591_v55 = vadd.f32 %v590_v47, %v3890_v10  ;;  %v1116_v45 = vadd.f32 %v1115_v22, %v3891_v13  ;;  %v3892_v48 = vld [vmem:[#allocation8_spill] sm:$0xff] }
 0x12b   : > { %v3653_v28 = vpop.permute.xlu1 %1431  ;;  %v3655_v50 = vpop.permute.xlu0 %1426  ;;  %v766_v51 = vadd.f32 %v765_v23, %v749_v46  ;;  %v1291_v54 = vadd.f32 %v1290_v19, %v1274_v9  ;;  %v623_v24 = vmax.f32 %v589_v32, 0.0  ;;  %v1148_v42 = vmax.f32 %v1114_v58, 0.0 }
 0x12c   : > { %v787_v7 = vadd.f32 %v786_v8, %v750_v15  ;;  %v1312_v17 = vadd.f32 %v1311_v11, %v1275_v20  ;;  %v624_v38 = vmax.f32 %v591_v55, 0.0  ;;  %v1149_v21 = vmax.f32 %v1116_v45, 0.0  ;;  %v1548_v35 = vpop.f32.mrb[32].mxu0  ;;  %v3657_v2 = vpop.f32.mrb[32].mxu1 }
 0x12d   : > { %v751_v30 = vmul.f32 %v3892_v48, %v623_v24  ;;  %v1276_v37 = vmul.f32 %v3557_v39, %v1148_v42  ;;  %v1549_v16 = vadd.f32 %v1548_v35, %v3571_v62  ;;  %v1550_v25 = vpop.f32.mrb[33].mxu0  ;;  %v3662_v3 = vpop.f32.mrb[33].mxu1 }
 0x12e   : > { %v752_v60 = vmul.f32 %v3892_v48, %v624_v38  ;;  %v1277_v0 = vmul.f32 %v3557_v39, %v1149_v21  ;;  %v1551_v27 = vadd.f32 %v1550_v25, %v3571_v62 }
 0x12f   : > { %v1699_v49 = vpop.permute.xlu1 %1698  ;;  %v1694_v18 = vpop.permute.xlu0 %1693  ;;  %v767_v53 = vadd.f32 %v766_v51, %v751_v30  ;;  %v1292_v52 = vadd.f32 %v1291_v54, %v1276_v37  ;;  %v1643_v1 = vmax.f32 %v1549_v16, 0.0 }
 0x130   : > { %v788_v23 = vadd.f32 %v787_v7, %v752_v60  ;;  %v1313_v19 = vadd.f32 %v1312_v17, %v1277_v0  ;;  %v1644_v33 = vmax.f32 %v1551_v27, 0.0  ;;  %v1554_v29 = vpop.f32.mrb[34].mxu0  ;;  %v3667_v8 = vpop.f32.mrb[34].mxu1 }
 0x131   : > { %v768_v11 = vrot.slane %v767_v53, 4  ;;  %v1293_v6 = vrot.slane %v1292_v52, 4  ;;  %v1771_v5 = vmul.f32 %v1694_v18, %v1643_v1  ;;  %v1555_v26 = vadd.f32 %v1554_v29, %v3569_v40  ;;  %v1556_v57 = vpop.f32.mrb[35].mxu0  ;;  %v3670_v39 = vpop.f32.mrb[35].mxu1 }
 0x132   : > { %v789_v62 = vrot.slane %v788_v23, 4  ;;  %v1314_v59 = vrot.slane %v1313_v19, 4  ;;  %v1772_v46 = vmul.f32 %v1694_v18, %v1644_v33  ;;  %v1557_v9 = vadd.f32 %v1556_v57, %v3569_v40 }
 0x133   : > { %v1709_v10 = vpop.permute.xlu1 %1708  ;;  %v1704_v32 = vpop.permute.xlu0 %1703  ;;  %v769_v13 = vadd.f32 %v768_v11, %v767_v53  ;;  %v1294_v58 = vadd.f32 %v1293_v6, %v1292_v52  ;;  %v1645_v47 = vmax.f32 %v1555_v26, 0.0 }
 0x134   : > { %v790_v22 = vadd.f32 %v789_v62, %v788_v23  ;;  %v1315_v15 = vadd.f32 %v1314_v59, %v1313_v19  ;;  %v1646_v20 = vmax.f32 %v1557_v9, 0.0  ;;  %v1560_v55 = vpop.f32.mrb[36].mxu0  ;;  %v3673_v45 = vpop.f32.mrb[36].mxu1 }
 0x135   : > { %v770_v51 = vrot.slane %v769_v13, 2  ;;  %v1295_v54 = vrot.slane %v1294_v58, 2  ;;  %v1773_v24 = vmul.f32 %v1699_v49, %v1645_v47  ;;  %v1561_v42 = vadd.f32 %v1560_v55, %v3583_v63  ;;  %v1562_v7 = vpop.f32.mrb[37].mxu0  ;;  %v3676_v17 = vpop.f32.mrb[37].mxu1 }
 0x136   : > { %v791_v40 = vrot.slane %v790_v22, 2  ;;  %v1316_v38 = vrot.slane %v1315_v15, 2  ;;  %v1774_v21 = vmul.f32 %v1699_v49, %v1646_v20  ;;  %v1563_v35 = vadd.f32 %v1562_v7, %v3583_v63 }
 0x137   : > { %v3679_v48 = vpop.permute.xlu1 %1718  ;;  %v1714_v30 = vpop.permute.xlu0 %1713  ;;  %v771_v37 = vadd.f32 %v770_v51, %v769_v13  ;;  %v1296_v16 = vadd.f32 %v1295_v54, %v1294_v58  ;;  %v1803_v25 = vadd.f32 %v1773_v24, %v1771_v5  ;;  %v1647_v60 = vmax.f32 %v1561_v42, 0.0 }
 0x138   : > { %v792_v0 = vadd.f32 %v791_v40, %v790_v22  ;;  %v1317_v27 = vadd.f32 %v1316_v38, %v1315_v15  ;;  %v1824_v18 = vadd.f32 %v1774_v21, %v1772_v46  ;;  %v1648_v53 = vmax.f32 %v1563_v35, 0.0  ;;  %v1566_v52 = vpop.f32.mrb[38].mxu0  ;;  %v3681_v1 = vpop.f32.mrb[38].mxu1 }
 0x139   : > { %v772_v23 = vrot.slane %v771_v37, 1  ;;  %v1297_v19 = vrot.slane %v1296_v16, 1  ;;  %v1775_v33 = vmul.f32 %v1704_v32, %v1647_v60  ;;  %v1567_v49 = vadd.f32 %v1566_v52, %v3581_v36  ;;  %v1568_v63 = vpop.f32.mrb[39].mxu0  ;;  %v3684_v29 = vpop.f32.mrb[39].mxu1 }
 0x13a   : > { %v793_v11 = vrot.slane %v792_v0, 1  ;;  %v1318_v6 = vrot.slane %v1317_v27, 1  ;;  %v1776_v26 = vmul.f32 %v1704_v32, %v1648_v53  ;;  %v1569_v5 = vadd.f32 %v1568_v63, %v3581_v36 }
 0x13b   : > { %v3687_v57 = vpop.permute.xlu1 %1728  ;;  %v1724_v62 = vpop.permute.xlu0 %1723  ;;  %v773_v59 = vadd.f32 %v772_v23, %v771_v37  ;;  %v1298_v46 = vadd.f32 %v1297_v19, %v1296_v16  ;;  %v1804_v9 = vadd.f32 %v1803_v25, %v1775_v33  ;;  %v1649_v13 = vmax.f32 %v1567_v49, 0.0 }
 0x13c   : > { %v794_v58 = vadd.f32 %v793_v11, %v792_v0  ;;  %v1319_v47 = vadd.f32 %v1318_v6, %v1317_v27  ;;  %v1825_v22 = vadd.f32 %v1824_v18, %v1776_v26  ;;  %v1650_v15 = vmax.f32 %v1569_v5, 0.0  ;;  %v1572_v20 = vpop.f32.mrb[40].mxu0  ;;  %v3689_v55 = vpop.f32.mrb[40].mxu1 }
 0x13d   : > { %v3691_v51 = vadd.f32 %v1298_v46, %v773_v59  ;;  %v1777_v54 = vmul.f32 %v1709_v10, %v1649_v13  ;;  %v1573_v32 = vadd.f32 %v1572_v20, %v3595_v43  ;;  %v1574_v36 = vpop.f32.mrb[41].mxu0  ;;  %v3694_v24 = vpop.f32.mrb[41].mxu1 }
 0x13e   : > { %v3696_v42 = vadd.f32 %v1319_v47, %v794_v58  ;;  %v1778_v7 = vmul.f32 %v1709_v10, %v1650_v15  ;;  %v1575_v40 = vadd.f32 %v1574_v36, %v3595_v43 }
 0x13f   : > { %v3699_v38 = vpop.permute.xlu1 %1738  ;;  %v3701_v21 = vpop.permute.xlu0 %1733  ;;  %v1805_v35 = vadd.f32 %v1804_v9, %v1777_v54  ;;  %v1651_v37 = vmax.f32 %v1573_v32, 0.0 }
 0x140   : > { %v1826_v16 = vadd.f32 %v1825_v22, %v1778_v7  ;;  %v1652_v25 = vmax.f32 %v1575_v40, 0.0  ;;  %v1578_v60 = vpop.f32.mrb[42].mxu0  ;;  %v3703_v0 = vpop.f32.mrb[42].mxu1 }
 0x141   : > { %v1779_v27 = vmul.f32 %v1714_v30, %v1651_v37  ;;  %v1579_v18 = vadd.f32 %v1578_v60, %v3593_v12  ;;  %v1580_v53 = vpop.f32.mrb[43].mxu0  ;;  %v3706_v52 = vpop.f32.mrb[43].mxu1 }
 0x142   : > { %v1780_v10 = vmul.f32 %v1714_v30, %v1652_v25  ;;  %v1581_v43 = vadd.f32 %v1580_v53, %v3593_v12 }
 0x143   : > { %v3709_v23 = vpop.permute.xlu1 %1748  ;;  %v3711_v19 = vpop.permute.xlu0 %1743  ;;  %v1806_v33 = vadd.f32 %v1805_v35, %v1779_v27  ;;  %v1653_v49 = vmax.f32 %v1579_v18, 0.0 }
 0x144   : > { %v1827_v63 = vadd.f32 %v1826_v16, %v1780_v10  ;;  %v1654_v11 = vmax.f32 %v1581_v43, 0.0  ;;  %v1584_v6 = vpop.f32.mrb[44].mxu0  ;;  %v3713_v26 = vpop.f32.mrb[44].mxu1 }
 0x145   : > { %v1781_v5 = vmul.f32 %v3679_v48, %v1653_v49  ;;  %v1585_v59 = vadd.f32 %v1584_v6, %v3607_v44  ;;  %v1586_v46 = vpop.f32.mrb[45].mxu0  ;;  %v3717_v9 = vpop.f32.mrb[45].mxu1 }
 0x146   : > { %v1782_v12 = vmul.f32 %v3679_v48, %v1654_v11  ;;  %v1587_v30 = vadd.f32 %v1586_v46, %v3607_v44 }
 0x147   : > { %v3721_v13 = vpop.permute.xlu1 %1758  ;;  %v3723_v58 = vpop.permute.xlu0 %1753  ;;  %v1807_v47 = vadd.f32 %v1806_v33, %v1781_v5  ;;  %v1655_v22 = vmax.f32 %v1585_v59, 0.0 }
 0x148   : > { %v1828_v15 = vadd.f32 %v1827_v63, %v1782_v12  ;;  %v1656_v20 = vmax.f32 %v1587_v30, 0.0  ;;  %v1590_v54 = vpop.f32.mrb[46].mxu0  ;;  %v3725_v32 = vpop.f32.mrb[46].mxu1 }
 0x149   : > { %v1783_v36 = vmul.f32 %v1724_v62, %v1655_v22  ;;  %v1591_v7 = vadd.f32 %v1590_v54, %v3605_v31  ;;  %v1592_v40 = vpop.f32.mrb[47].mxu0  ;;  %v3728_v35 = vpop.f32.mrb[47].mxu1 }
 0x14a   : > { %v1784_v48 = vmul.f32 %v1724_v62, %v1656_v20  ;;  %v1593_v44 = vadd.f32 %v1592_v40, %v3605_v31 }
 0x14b   : > { %v3731_v37 = vpop.permute.xlu1 %1768  ;;  %v3733_v16 = vpop.permute.xlu0 %1763  ;;  %v1808_v25 = vadd.f32 %v1807_v47, %v1783_v36  ;;  %v1657_v60 = vmax.f32 %v1591_v7, 0.0 }
 0x14c   : > { %v1829_v27 = vadd.f32 %v1828_v15, %v1784_v48  ;;  %v1658_v18 = vmax.f32 %v1593_v44, 0.0  ;;  %v1596_v53 = vpop.f32.mrb[48].mxu0  ;;  %v3735_v10 = vpop.f32.mrb[48].mxu1 }
 0x14d   : > { %v1785_v43 = vmul.f32 %v3687_v57, %v1657_v60  ;;  %v1597_v33 = vadd.f32 %v1596_v53, %v3619_v61  ;;  %v1598_v49 = vpop.f32.mrb[49].mxu0  ;;  %v3739_v63 = vpop.f32.mrb[49].mxu1 }
 0x14e   : > { %v1786_v31 = vmul.f32 %v3687_v57, %v1658_v18  ;;  %v1599_v62 = vadd.f32 %v1598_v49, %v3619_v61 }
 0x14f   : > { %v1887_v11 = vpop.permute.xlu1 %1886  ;;  %v1882_v6 = vpop.permute.xlu0 %1881  ;;  %v1809_v5 = vadd.f32 %v1808_v25, %v1785_v43  ;;  %v1659_v59 = vmax.f32 %v1597_v33, 0.0 }
 0x150   : > { %v2080_v46 = vadd.f32 %v3667_v8, %v1887_v11  ;;  %v2074_v12 = vadd.f32 %v3657_v2, %v1882_v6  ;;  %v1830_v30 = vadd.f32 %v1829_v27, %v1786_v31  ;;  %v1660_v47 = vmax.f32 %v1599_v62, 0.0  ;;  %v1602_v20 = vpop.f32.mrb[50].mxu0  ;;  %v3747_v54 = vpop.f32.mrb[50].mxu1 }
 0x151   : > { %v2076_v22 = vadd.f32 %v3662_v3, %v1882_v6  ;;  %v2082_v15 = vadd.f32 %v3670_v39, %v1887_v11  ;;  %v1787_v57 = vmul.f32 %v3701_v21, %v1659_v59  ;;  %v1603_v61 = vadd.f32 %v1602_v20, %v3617_v41  ;;  %v1604_v36 = vpop.f32.mrb[51].mxu0  ;;  %v3751_v7 = vpop.f32.mrb[51].mxu1 }
 0x152   : > { %v1788_v8 = vmul.f32 %v3701_v21, %v1660_v47  ;;  %v2170_v40 = vmax.f32 %v2080_v46, 0.0  ;;  %v2168_v2 = vmax.f32 %v2074_v12, 0.0  ;;  %v1605_v48 = vadd.f32 %v1604_v36, %v3617_v41 }
 0x153   : > { %v1897_v44 = vpop.permute.xlu1 %1896  ;;  %v1892_v3 = vpop.permute.xlu0 %1891  ;;  %v1810_v25 = vadd.f32 %v1809_v5, %v1787_v57  ;;  %v1661_v39 = vmax.f32 %v1603_v61, 0.0  ;;  %v2169_v53 = vmax.f32 %v2076_v22, 0.0  ;;  %v2171_v43 = vmax.f32 %v2082_v15, 0.0 }
 0x154   : > { %v3756_v60 = vadd.f32 %v3681_v1, %v1897_v44  ;;  %v2086_v27 = vadd.f32 %v3673_v45, %v1892_v3  ;;  %v1831_v18 = vadd.f32 %v1830_v30, %v1788_v8  ;;  %v1662_v33 = vmax.f32 %v1605_v48, 0.0  ;;  %v1608_v49 = vpop.f32.mrb[52].mxu0  ;;  %v3759_v31 = vpop.f32.mrb[52].mxu1 }
 0x155   : > { %v1789_v21 = vmul.f32 %v3699_v38, %v1661_v39  ;;  %v2088_v41 = vadd.f32 %v3676_v17, %v1892_v3  ;;  %v2094_v62 = vadd.f32 %v3684_v29, %v1897_v44  ;;  %v1609_v11 = vadd.f32 %v1608_v49, %v3631_v14  ;;  %v1610_v6 = vpop.f32.mrb[53].mxu0  ;;  %v3765_v1 = vpop.f32.mrb[53].mxu1 }
 0x156   : > { %v1790_v45 = vmul.f32 %v3699_v38, %v1662_v33  ;;  %v2174_v5 = vmax.f32 %v3756_v60, 0.0  ;;  %v2172_v59 = vmax.f32 %v2086_v27, 0.0  ;;  %v1611_v46 = vadd.f32 %v1610_v6, %v3631_v14 }
 0x157   : > { %v2224_v12 = vpop.permute.xlu1 %2223  ;;  %v2219_v30 = vpop.permute.xlu0 %2218  ;;  %v1811_v47 = vadd.f32 %v1810_v25, %v1789_v21  ;;  %v1663_v22 = vmax.f32 %v1609_v11, 0.0  ;;  %v2173_v48 = vmax.f32 %v2088_v41, 0.0  ;;  %v2175_v38 = vmax.f32 %v2094_v62, 0.0 }
 0x158   : > { %v2298_v15 = vmul.f32 %v2224_v12, %v2170_v40  ;;  %v2299_v17 = vmul.f32 %v2224_v12, %v2171_v43  ;;  %v1832_v20 = vadd.f32 %v1831_v18, %v1790_v45  ;;  %v1664_v29 = vmax.f32 %v1611_v46, 0.0  ;;  %v1614_v36 = vpop.f32.mrb[54].mxu0  ;;  %v3770_v8 = vpop.f32.mrb[54].mxu1 }
 0x159   : > { %v2296_v57 = vmul.f32 %v2219_v30, %v2168_v2  ;;  %v2297_v61 = vmul.f32 %v2219_v30, %v2169_v53  ;;  %v1791_v44 = vmul.f32 %v3711_v19, %v1663_v22  ;;  %v1615_v3 = vadd.f32 %v1614_v36, %v3629_v34  ;;  %v1616_v14 = vpop.f32.mrb[55].mxu0  ;;  %v3774_v39 = vpop.f32.mrb[55].mxu1 }
 0x15a   : > { %v1792_v25 = vmul.f32 %v3711_v19, %v1664_v29  ;;  %v1617_v27 = vadd.f32 %v1616_v14, %v3629_v34 }
 0x15b   : > { %v2328_v40 = vadd.f32 %v2298_v15, %v2296_v57  ;;  %v2349_v60 = vadd.f32 %v2299_v17, %v2297_v61  ;;  %v2229_v2 = vpop.permute.xlu1 %2228  ;;  %v1902_v18 = vpop.permute.xlu0 %1901  ;;  %v1812_v53 = vadd.f32 %v1811_v47, %v1791_v44  ;;  %v1665_v43 = vmax.f32 %v1615_v3, 0.0 }
 0x15c   : > { %v2300_v33 = vmul.f32 %v2229_v2, %v2172_v59  ;;  %v2301_v49 = vmul.f32 %v2229_v2, %v2173_v48  ;;  %v1833_v21 = vadd.f32 %v1832_v20, %v1792_v25  ;;  %v1666_v41 = vmax.f32 %v1617_v27, 0.0  ;;  %v1620_v6 = vpop.f32.mrb[56].mxu0  ;;  %v3780_v45 = vpop.f32.mrb[56].mxu1 }
 0x15d   : > { %v2098_v62 = vadd.f32 %v3689_v55, %v1902_v18  ;;  %v2100_v11 = vadd.f32 %v3694_v24, %v1902_v18  ;;  %v1793_v19 = vmul.f32 %v3709_v23, %v1665_v43  ;;  %v1621_v34 = vadd.f32 %v1620_v6, %v3643_v4  ;;  %v1622_v30 = vpop.f32.mrb[57].mxu0  ;;  %v3784_v47 = vpop.f32.mrb[57].mxu1 }
 0x15e   : > { %v2329_v46 = vadd.f32 %v2328_v40, %v2300_v33  ;;  %v2350_v12 = vadd.f32 %v2349_v60, %v2301_v49  ;;  %v1794_v59 = vmul.f32 %v3709_v23, %v1666_v41  ;;  %v1623_v55 = vadd.f32 %v1622_v30, %v3643_v4 }
 0x15f   : > { %v2176_v22 = vmax.f32 %v2098_v62, 0.0  ;;  %v2177_v15 = vmax.f32 %v2100_v11, 0.0  ;;  %v2234_v17 = vpop.permute.xlu1 %2233  ;;  %v1907_v24 = vpop.permute.xlu0 %1906  ;;  %v1813_v20 = vadd.f32 %v1812_v53, %v1793_v19  ;;  %v1667_v29 = vmax.f32 %v1621_v34, 0.0 }
 0x160   : > { %v2302_v57 = vmul.f32 %v2234_v17, %v2174_v5  ;;  %v2303_v61 = vmul.f32 %v2234_v17, %v2175_v38  ;;  %v1834_v36 = vadd.f32 %v1833_v21, %v1794_v59  ;;  %v1668_v48 = vmax.f32 %v1623_v55, 0.0  ;;  %v1626_v14 = vpop.f32.mrb[58].mxu0  ;;  %v3790_v25 = vpop.f32.mrb[58].mxu1 }
 0x161   : > { %v2104_v44 = vadd.f32 %v3703_v0, %v1907_v24  ;;  %v2106_v3 = vadd.f32 %v3706_v52, %v1907_v24  ;;  %v1795_v23 = vmul.f32 %v3723_v58, %v1667_v29  ;;  %v1627_v4 = vadd.f32 %v1626_v14, %v3641_v56  ;;  %v1628_v27 = vpop.f32.mrb[59].mxu0  ;;  %v3794_v2 = vpop.f32.mrb[59].mxu1 }
 0x162   : > { %v2330_v40 = vadd.f32 %v2329_v46, %v2302_v57  ;;  %v2351_v60 = vadd.f32 %v2350_v12, %v2303_v61  ;;  %v1796_v5 = vmul.f32 %v3723_v58, %v1668_v48  ;;  %v1629_v0 = vadd.f32 %v1628_v27, %v3641_v56 }
 0x163   : > { %v2178_v38 = vmax.f32 %v2104_v44, 0.0  ;;  %v2179_v18 = vmax.f32 %v2106_v3, 0.0  ;;  %v2239_v53 = vpop.permute.xlu1 %2238  ;;  %v1912_v52 = vpop.permute.xlu0 %1911  ;;  %v1814_v43 = vadd.f32 %v1813_v20, %v1795_v23  ;;  %v1669_v33 = vmax.f32 %v1627_v4, 0.0 }
 0x164   : > { %v2304_v49 = vmul.f32 %v2239_v53, %v2176_v22  ;;  %v2305_v21 = vmul.f32 %v2239_v53, %v2177_v15  ;;  %v1835_v41 = vadd.f32 %v1834_v36, %v1796_v5  ;;  %v1670_v62 = vmax.f32 %v1629_v0, 0.0  ;;  %v1632_v19 = vpop.f32.mrb[60].mxu0  ;;  %v3800_v46 = vpop.f32.mrb[60].mxu1 }
 0x165   : > { %v2110_v11 = vadd.f32 %v3713_v26, %v1912_v52  ;;  %v2112_v6 = vadd.f32 %v3717_v9, %v1912_v52  ;;  %v1797_v58 = vmul.f32 %v3721_v13, %v1669_v33  ;;  %v1633_v56 = vadd.f32 %v1632_v19, %v3655_v50  ;;  %v1634_v30 = vpop.f32.mrb[61].mxu0  ;;  %v3804_v59 = vpop.f32.mrb[61].mxu1 }
 0x166   : > { %v2331_v12 = vadd.f32 %v2330_v40, %v2304_v49  ;;  %v2352_v34 = vadd.f32 %v2351_v60, %v2305_v21  ;;  %v1798_v22 = vmul.f32 %v3721_v13, %v1670_v62  ;;  %v1635_v26 = vadd.f32 %v1634_v30, %v3655_v50 }
 0x167   : > { %v2180_v15 = vmax.f32 %v2110_v11, 0.0  ;;  %v2181_v55 = vmax.f32 %v2112_v6, 0.0  ;;  %v2244_v17 = vpop.permute.xlu1 %2243  ;;  %v1917_v9 = vpop.permute.xlu0 %1916  ;;  %v1815_v24 = vadd.f32 %v1814_v43, %v1797_v58  ;;  %v1671_v20 = vmax.f32 %v1633_v56, 0.0 }
 0x168   : > { %v2306_v29 = vmul.f32 %v2244_v17, %v2178_v38  ;;  %v2307_v57 = vmul.f32 %v2244_v17, %v2179_v18  ;;  %v1836_v61 = vadd.f32 %v1835_v41, %v1798_v22  ;;  %v1672_v36 = vmax.f32 %v1635_v26, 0.0  ;;  %v1638_v3 = vpop.f32.mrb[62].mxu0  ;;  %v3810_v14 = vpop.f32.mrb[62].mxu1 }
 0x169   : > { %v2116_v48 = vadd.f32 %v3725_v32, %v1917_v9  ;;  %v2118_v44 = vadd.f32 %v3728_v35, %v1917_v9  ;;  %v1799_v13 = vmul.f32 %v3733_v16, %v1671_v20  ;;  %v1639_v50 = vadd.f32 %v1638_v3, %v3653_v28  ;;  %v1640_v60 = vpop.f32.mrb[63].mxu0  ;;  %v3814_v4 = vpop.f32.mrb[63].mxu1 }
 0x16a   : > { %v2332_v23 = vadd.f32 %v2331_v12, %v2306_v29  ;;  %v2353_v40 = vadd.f32 %v2352_v34, %v2307_v57  ;;  %v1800_v27 = vmul.f32 %v3733_v16, %v1672_v36  ;;  %v1641_v38 = vadd.f32 %v1640_v60, %v3653_v28 }
 0x16b   : > { %v2182_v5 = vmax.f32 %v2116_v48, 0.0  ;;  %v2249_v32 = vpop.permute.xlu1 %2248  ;;  %v1922_v18 = vpop.permute.xlu0 %1921  ;;  %v1816_v35 = vadd.f32 %v1815_v24, %v1799_v13  ;;  %v1673_v0 = vmax.f32 %v1639_v50, 0.0  ;;  %v2183_v41 = vmax.f32 %v2118_v44, 0.0 }
 0x16c   : > { %v2308_v53 = vmul.f32 %v2249_v32, %v2180_v15  ;;  %v2309_v52 = vmul.f32 %v2249_v32, %v2181_v55  ;;  %v1837_v43 = vadd.f32 %v1836_v61, %v1800_v27  ;;  %v1674_v33 = vmax.f32 %v1641_v38, 0.0 }
 0x16d   : > { %v2122_v49 = vadd.f32 %v3735_v10, %v1922_v18  ;;  %v2124_v21 = vadd.f32 %v3739_v63, %v1922_v18  ;;  %v1801_v62 = vmul.f32 %v3731_v37, %v1673_v0 }
 0x16e   : > { %v2333_v11 = vadd.f32 %v2332_v23, %v2308_v53  ;;  %v2354_v16 = vadd.f32 %v2353_v40, %v2309_v52  ;;  %v1802_v6 = vmul.f32 %v3731_v37, %v1674_v33 }
 0x16f   : > { %v2254_v28 = vpop.permute.xlu1 %2253  ;;  %v1927_v19 = vpop.permute.xlu0 %1926  ;;  %v1817_v58 = vadd.f32 %v1816_v35, %v1801_v62  ;;  %v2184_v30 = vmax.f32 %v2122_v49, 0.0  ;;  %v2185_v22 = vmax.f32 %v2124_v21, 0.0 }
 0x170   : > { %v2310_v12 = vmul.f32 %v2254_v28, %v2182_v5  ;;  %v2311_v34 = vmul.f32 %v2254_v28, %v2183_v41  ;;  %v1838_v56 = vadd.f32 %v1837_v43, %v1802_v6  ;;  %v2128_v15 = vadd.f32 %v3747_v54, %v1927_v19 }
 0x171   : > { %v1818_v10 = vrot.slane %v1817_v58, 4  ;;  %v2130_v26 = vadd.f32 %v3751_v7, %v1927_v19 }
 0x172   : > { %v2334_v55 = vadd.f32 %v2333_v11, %v2310_v12  ;;  %v2355_v63 = vadd.f32 %v2354_v16, %v2311_v34  ;;  %v1839_v17 = vrot.slane %v1838_v56, 4  ;;  %v2186_v61 = vmax.f32 %v2128_v15, 0.0 }
 0x173   : > { %v2259_v9 = vpop.permute.xlu1 %2258  ;;  %v1932_v24 = vpop.permute.xlu0 %1931  ;;  %v1819_v20 = vadd.f32 %v1818_v10, %v1817_v58  ;;  %v2187_v3 = vmax.f32 %v2130_v26, 0.0 }
 0x174   : > { %v2312_v37 = vmul.f32 %v2259_v9, %v2184_v30  ;;  %v2313_v29 = vmul.f32 %v2259_v9, %v2185_v22  ;;  %v1840_v57 = vadd.f32 %v1839_v17, %v1838_v56  ;;  %v2134_v36 = vadd.f32 %v3759_v31, %v1932_v24 }
 0x175   : > { %v2136_v48 = vadd.f32 %v3765_v1, %v1932_v24  ;;  %v1820_v44 = vrot.slane %v1819_v20, 2 }
 0x176   : > { %v2335_v54 = vadd.f32 %v2334_v55, %v2312_v37  ;;  %v2356_v13 = vadd.f32 %v2355_v63, %v2313_v29  ;;  %v1841_v23 = vrot.slane %v1840_v57, 2  ;;  %v2188_v38 = vmax.f32 %v2134_v36, 0.0 }
 0x177   : > { %v2264_v40 = vpop.permute.xlu1 %2263  ;;  %v1937_v50 = vpop.permute.xlu0 %1936  ;;  %v1821_v7 = vadd.f32 %v1820_v44, %v1819_v20  ;;  %v2189_v32 = vmax.f32 %v2136_v48, 0.0 }
 0x178   : > { %v2314_v60 = vmul.f32 %v2264_v40, %v2186_v61  ;;  %v2315_v27 = vmul.f32 %v2264_v40, %v2187_v3  ;;  %v1842_v5 = vadd.f32 %v1841_v23, %v1840_v57  ;;  %v2140_v18 = vadd.f32 %v3770_v8, %v1937_v50 }
 0x179   : > { %v1822_v35 = vrot.slane %v1821_v7, 1  ;;  %v2142_v1 = vadd.f32 %v3774_v39, %v1937_v50 }
 0x17a   : > { %v2336_v0 = vadd.f32 %v2335_v54, %v2314_v60  ;;  %v2357_v31 = vadd.f32 %v2356_v13, %v2315_v27  ;;  %v1843_v53 = vrot.slane %v1842_v5, 1  ;;  %v2190_v62 = vmax.f32 %v2140_v18, 0.0 }
 0x17b   : > { %v2269_v52 = vpop.permute.xlu1 %2268  ;;  %v1942_v43 = vpop.permute.xlu0 %1941  ;;  %v1823_v33 = vadd.f32 %v1822_v35, %v1821_v7  ;;  %v2191_v8 = vmax.f32 %v2142_v1, 0.0  ;;  %v2619_v1 = vmov 1966171168  }
 0x17c   : > { %v2316_v49 = vmul.f32 %v2269_v52, %v2188_v38  ;;  %v2317_v21 = vmul.f32 %v2269_v52, %v2189_v32  ;;  %v1844_v41 = vadd.f32 %v1843_v53, %v1842_v5  ;;  %v2146_v11 = vadd.f32 %v3780_v45, %v1942_v43 }
 0x17d   : > { %v2148_v16 = vadd.f32 %v3784_v47, %v1942_v43  ;;  %v3831_v6 = vadd.f32 %v1823_v33, %v3691_v51  ;;  %v2380_v53 = vunpack.c.l.s4 %v2619_v1  ;;  %v2382_v52 = vlaneseq }
 0x17e   : > { %v2337_v28 = vadd.f32 %v2336_v0, %v2316_v49  ;;  %v2358_v19 = vadd.f32 %v2357_v31, %v2317_v21  ;;  %v3834_v39 = vadd.f32 %v1844_v41, %v3696_v42  ;;  %v2192_v30 = vmax.f32 %v2146_v11, 0.0 }
 0x17f   : > { %v2274_v58 = vpop.permute.xlu1 %2273  ;;  %v1947_v12 = vpop.permute.xlu0 %1946  ;;  %v2193_v22 = vmax.f32 %v2148_v16, 0.0  ;;  %v2381_v41 = vunpack.c.0.s8 %v2380_v53  ;;  %vm2396_vm2 = vcmp.lt.s32.totalorder %v2382_v52, 256 }
 0x180   : > { %v2318_v34 = vmul.f32 %v2274_v58, %v2190_v62  ;;  %v2319_v56 = vmul.f32 %v2274_v58, %v2191_v8  ;;  %v2152_v45 = vadd.f32 %v3790_v25, %v1947_v12  ;;  %v2154_v47 = vadd.f32 %v3794_v2, %v1947_v12 }
 0x181   : > { %v2383_v62 = vshrl.u32 %v2382_v52, 7  ;;  %v2373_v8 = vstv %s2372_s12 }
 0x182   : > { %v2338_v15 = vadd.f32 %v2337_v28, %v2318_v34  ;;  %v2359_v10 = vadd.f32 %v2358_v19, %v2319_v56  ;;  %v2194_v9 = vmax.f32 %v2152_v45, 0.0  ;;  %v2195_v24 = vmax.f32 %v2154_v47, 0.0 }
 0x183   : > { %v2279_v51 = vpop.permute.xlu1 %2278  ;;  %v1952_v55 = vpop.permute.xlu0 %1951  ;;  %v2384_v58 = vsub.s32 %v2381_v41, %v2383_v62 }
 0x184   : > { %v2320_v63 = vmul.f32 %v2279_v51, %v2192_v30  ;;  %v2321_v26 = vmul.f32 %v2279_v51, %v2193_v22  ;;  %v2158_v17 = vadd.f32 %v3800_v46, %v1952_v55  ;;  %v2160_v42 = vadd.f32 %v3804_v59, %v1952_v55 }
 0x186   : > { %v2339_v20 = vadd.f32 %v2338_v15, %v2320_v63  ;;  %v2360_v37 = vadd.f32 %v2359_v10, %v2321_v26  ;;  %v2196_v48 = vmax.f32 %v2158_v17, 0.0  ;;  %v2197_v44 = vmax.f32 %v2160_v42, 0.0 }
 0x187   : > { %v2284_v29 = vpop.permute.xlu1 %2283  ;;  %v1957_v57 = vpop.permute.xlu0 %1956 }
 0x188   : > { %v2322_v61 = vmul.f32 %v2284_v29, %v2194_v9  ;;  %v2323_v36 = vmul.f32 %v2284_v29, %v2195_v24  ;;  %v2164_v25 = vadd.f32 %v3810_v14, %v1957_v57  ;;  %v2166_v2 = vadd.f32 %v3814_v4, %v1957_v57 }
 0x18a   : > { %v2340_v3 = vadd.f32 %v2339_v20, %v2322_v61  ;;  %v2361_v54 = vadd.f32 %v2360_v37, %v2323_v36  ;;  %v2198_v13 = vmax.f32 %v2164_v25, 0.0  ;;  %v2199_v46 = vmax.f32 %v2166_v2, 0.0 }
 0x18b   : > { %v2294_v23 = vpop.permute.xlu1 %2293  ;;  %v2289_v59 = vpop.permute.xlu0 %2288 }
 0x18c   : > { %v2324_v40 = vmul.f32 %v2289_v59, %v2196_v48  ;;  %v2325_v50 = vmul.f32 %v2289_v59, %v2197_v44  ;;  %v2326_v7 = vmul.f32 %v2294_v23, %v2198_v13  ;;  %v2327_v60 = vmul.f32 %v2294_v23, %v2199_v46 }
 0x18e   : > { %v2341_v27 = vadd.f32 %v2340_v3, %v2324_v40  ;;  %v2362_v5 = vadd.f32 %v2361_v54, %v2325_v50 }
 0x190   : > { %v2342_v38 = vadd.f32 %v2341_v27, %v2326_v7  ;;  %v2363_v32 = vadd.f32 %v2362_v5, %v2327_v60 }
 0x192   : > { %v2343_v18 = vrot.slane %v2342_v38, 4  ;;  %v2364_v14 = vrot.slane %v2363_v32, 4 }
 0x194   : > { %v2344_v35 = vadd.f32 %v2343_v18, %v2342_v38  ;;  %v2365_v4 = vadd.f32 %v2364_v14, %v2363_v32 }
 0x196   : > { %v2345_v0 = vrot.slane %v2344_v35, 2  ;;  %v2366_v31 = vrot.slane %v2365_v4, 2 }
 0x198   : > { %v2346_v43 = vadd.f32 %v2345_v0, %v2344_v35  ;;  %v2367_v33 = vadd.f32 %v2366_v31, %v2365_v4 }
 0x19a   : > { %v2347_v49 = vrot.slane %v2346_v43, 1  ;;  %v2368_v21 = vrot.slane %v2367_v33, 1 }
 0x19c   : > { %v2348_v11 = vadd.f32 %v2347_v49, %v2346_v43  ;;  %v2369_v16 = vadd.f32 %v2368_v21, %v2367_v33 }
 0x19e   : > { %v2370_v28 = vadd.f32 %v2348_v11, %v3831_v6  ;;  %v2371_v19 = vadd.f32 %v2369_v16, %v3834_v39 }
 0x1a0   : > { %v2374_v12 = vadd.f32 %v2373_v8, %v2370_v28  ;;  %v2375_v34 = vadd.f32 %v2373_v8, %v2371_v19 }
 0x1a2   : > { %v2378_v56 = vcombine.low %v2374_v12, %v2375_v34 }
 0x1a4   : > { %v2385_v30 = vrot.slane %v2378_v56, %v2384_v58 }
 0x1a6   : > { %v2392_v22 = vrot.slane %v2385_v30, %v2384_v58 }
 0x1a8   : > { %2398 = vst.msk [vmem:[%s261_s16] sm:$0x3] %vm2396_vm2, %v2392_v22 }
 0x1a9 PF: > { %s16_s22 = sadd.s32 1, %s2615_s22   ;;  %s3893_s20 = smov %s2611_s21 }
 0x1aa   : > { %p13_p5 = scmp.ge.s32.totalorder %s16_s22, 4   ;;  %s3894_s21 = smov %s3896_s4 }
 0x1ac   :  { %15 = sbr.rel (!%p13_p5) target bundleno = 2 (0x2), region = 70 }

</bundles_post_ra>
